<compile_context>
chip_gen: v5e
topology: v5e:2x2
jax: 0.10.0
libtpu: 0.0.40
codegen_flags: <defaults>
</compile_context>

<pallas_src>
import math
import functools

import jax
import jax.numpy as jnp
from jax import lax
from jax.experimental import pallas as pl
from jax.experimental.pallas import tpu as pltpu


def _round_up(n, m):
    return ((n + m - 1) // m) * m


def _gelu_tanh(x):
    # PyTorch F.gelu(..., approximate='tanh'). Python-scalar constants are
    # weakly typed, so this runs natively in bf16 when x is bf16.
    c = math.sqrt(2.0 / math.pi)
    return 0.5 * x * (1.0 + jnp.tanh(c * (x + 0.044715 * x * x * x)))


def _layernorm_no_affine(x, eps):
    # Single pass (var = E[x^2] - E[x]^2) with a clamp so catastrophic
    # cancellation can never hand lax.rsqrt a negative argument.
    mu = jnp.mean(x, axis=-1, keepdims=True)
    ms = jnp.mean(x * x, axis=-1, keepdims=True)
    var = jnp.maximum(ms - mu * mu, 0.0)
    return (x - mu) * lax.rsqrt(var + eps)


def ffn_kernel(x_ref, w1v_ref, w1g_ref, w2_ref, o_ref, *, eps, bf16_elementwise):
    # x_ref: [tm, H] (bf16); w1v/w1g: [H, I] bf16; w2: [I, H] bf16; o_ref: [tm, H].
    x = x_ref[...].astype(jnp.float32)

    # LayerNorm 1 (no affine): statistics in f32, bf16 operands into the MXU.
    xn = _layernorm_no_affine(x, eps).astype(jnp.bfloat16)

    # Linear 1 (no bias), pre-split into value / gate halves; f32 accumulation.
    val = jnp.dot(xn, w1v_ref[...], preferred_element_type=jnp.float32)
    gate = jnp.dot(xn, w1g_ref[...], preferred_element_type=jnp.float32)

    # GeGLU. bf16 elementwise on v6e/v7x (bf16 VALU/EUP), f32 on v5e.
    if bf16_elementwise:
        g = val.astype(jnp.bfloat16) * _gelu_tanh(gate.astype(jnp.bfloat16))
        g = g.astype(jnp.float32)
    else:
        g = val * _gelu_tanh(gate)

    # LayerNorm 2 (no affine): statistics in f32, bf16 into the second dot.
    gn = _layernorm_no_affine(g, eps).astype(jnp.bfloat16)

    # Linear 2 (no bias): [tm, I] @ [I, H] -> [tm, H], f32 accumulate.
    out = jnp.dot(gn, w2_ref[...], preferred_element_type=jnp.float32)

    # Dropout: inference-mode identity.
    o_ref[...] = out.astype(o_ref.dtype)


def prepare_params(w1, w2, dtype=jnp.bfloat16):
    """One-time prep from torch layout. w1: [2I, H], w2: [H, I].

    Returns (w1_val [H, I], w1_gate [H, I], w2_t [I, H]) in `dtype`.
    torch chunk(2, dim=-1) on h = x @ w1.T means rows [:I] of w1 are the value
    half and rows [I:] are the gate half.
    NOTE: H and I are assumed to be multiples of 128 (true for ELC-BERT base);
    pad them at prep time if a variant violates this.
    """
    two_I = w1.shape[0]
    I = two_I // 2
    w1_t = jnp.transpose(w1).astype(dtype)          # [H, 2I]
    w1_val = w1_t[:, :I]                            # [H, I]
    w1_gate = w1_t[:, I:]                           # [H, I]
    w2_t = jnp.transpose(w2).astype(dtype)          # [I, H]
    return w1_val, w1_gate, w2_t


def _vmem_limit_bytes():
    # Generation-aware: ~80% of physical per-core VMEM (headroom for Mosaic
    # internal scratch, semaphores, pipeline buffers).
    try:
        cap = pltpu.get_tpu_info().vmem_capacity_bytes
    except Exception:
        cap = 64 * 1024 * 1024  # conservative fallback (v7x-sized VMEM)
    return int(cap * 0.8)


def _bf16_elementwise_ok():
    # v5e has no bf16 VALU/EUP -> keep GeGLU math in f32 there.
    try:
        kind = jax.devices()[0].device_kind.lower()
    except Exception:
        return True
    return "v5" not in kind


def feed_forward(x, params, *, eps=1e-7, tm=512, activation_dtype=jnp.bfloat16):
    """x: [batch, seq, hidden]; params = prepare_params(w1, w2)."""
    w1_val, w1_gate, w2_t = params
    B, S, H = x.shape
    I = w1_val.shape[1]
    rows = B * S
    out_dtype = x.dtype

    # Stream activations as bf16 (weights are already resident bf16); no jnp.pad:
    # the ragged tail block is handled by Pallas (masked writeback).
    x2d = x.reshape(rows, H).astype(activation_dtype)

    # Row tile: big by default, clamped to the row count; split into >=2 grid
    # steps when possible so v7x's two TensorCores both get work.
    tm_eff = min(tm, _round_up(rows, 16))
    nsteps = pl.cdiv(rows, tm_eff)
    if nsteps < 2 and rows > 16:
        tm_eff = _round_up(pl.cdiv(rows, 2), 16)
        nsteps = pl.cdiv(rows, tm_eff)

    kernel = functools.partial(
        ffn_kernel, eps=eps, bf16_elementwise=_bf16_elementwise_ok())

    cost = pl.CostEstimate(
        flops=6 * rows * H * I,
        transcendentals=rows * I,
        bytes_accessed=(x2d.size * x2d.dtype.itemsize
                        + rows * H * jnp.dtype(out_dtype).itemsize
                        + (w1_val.size + w1_gate.size + w2_t.size)
                        * w2_t.dtype.itemsize),
    )

    out2d = pl.pallas_call(
        kernel,
        out_shape=jax.ShapeDtypeStruct((rows, H), out_dtype),
        grid_spec=pltpu.PrefetchScalarGridSpec(
            num_scalar_prefetch=0,
            grid=(nsteps,),
            in_specs=[
                pl.BlockSpec((tm_eff, H), lambda i: (i, 0)),
                # Weights: constant index map -> fetched once; single-buffered
                # so the pipeline doesn't double the resident weight VMEM.
                pl.BlockSpec((H, I), lambda i: (0, 0),
                             pipeline_mode=pl.Buffered(1)),
                pl.BlockSpec((H, I), lambda i: (0, 0),
                             pipeline_mode=pl.Buffered(1)),
                pl.BlockSpec((I, H), lambda i: (0, 0),
                             pipeline_mode=pl.Buffered(1)),
            ],
            out_specs=pl.BlockSpec((tm_eff, H), lambda i: (i, 0)),
        ),
        compiler_params=pltpu.CompilerParams(
            dimension_semantics=("parallel",),
            vmem_limit_bytes=_vmem_limit_bytes(),
        ),
        cost_estimate=cost,
    )(x2d, w1_val, w1_gate, w2_t)

    return out2d.reshape(B, S, H)


def init_params(key, hidden_size, intermediate_size, dtype=jnp.float32):
    """Deterministic init matching FeedForward.initialize (trunc normal, +/- 2*std).

    Returns weights in torch layout: w1 [2I, H], w2 [H, I].
    """
    std = math.sqrt(2.0 / (5.0 * hidden_size))
    k1, k2 = jax.random.split(key)
    w1 = std * jax.random.truncated_normal(
        k1, -2.0, 2.0, (2 * intermediate_size, hidden_size), dtype)
    w2 = std * jax.random.truncated_normal(
        k2, -2.0, 2.0, (hidden_size, intermediate_size), dtype)
    return w1, w2


def _reference(x, w1, w2, eps):
    # Pure-JAX f32 reference for sanity checking (torch-layout weights).
    xn = _layernorm_no_affine(x.astype(jnp.float32), eps)
    h = xn @ w1.T.astype(jnp.float32)
    I = w1.shape[0] // 2
    g = h[..., :I] * _gelu_tanh(h[..., I:])
    gn = _layernorm_no_affine(g, eps)
    return (gn @ w2.T.astype(jnp.float32)).astype(x.dtype)


if __name__ == "__main__":
    hidden_size = 128
    intermediate_size = 256
    layer_norm_eps = 1e-7
    batch, seq = 2, 64

    key = jax.random.PRNGKey(0)
    kx, kw = jax.random.split(key)
    x = jax.random.normal(kx, (batch, seq, hidden_size), jnp.float32)
    w1, w2 = init_params(kw, hidden_size, intermediate_size)

    params = prepare_params(w1, w2)  # one-time transpose + bf16 cast

    out = feed_forward(x, params, eps=layer_norm_eps)
    out = jax.block_until_ready(out)

    ref = _reference(x, w1, w2, layer_norm_eps)
    assert out.shape == (batch, seq, hidden_size)
    # bf16 activations/weights through two matmuls + LN vs f32 reference ->
    # loosened tolerance (expected numerical difference, not a bug).
    assert jnp.all(jnp.isfinite(out)), "non-finite output"
    assert jnp.allclose(out, ref, atol=1e-1, rtol=1e-1), "mismatch vs reference"

    print("KERNEL_OK")
</pallas_src>

<mosaic_0001>
module attributes {stable_mosaic.version = 11 : i64} {
  func.func @ffn_kernel(%arg0: i32, %arg1: memref<64x128xbf16, #tpu.memory_space<vmem>>, %arg2: memref<128x256xbf16, #tpu.memory_space<vmem>>, %arg3: memref<128x256xbf16, #tpu.memory_space<vmem>>, %arg4: memref<256x128xbf16, #tpu.memory_space<vmem>>, %arg5: memref<64x128xf32, #tpu.memory_space<vmem>>) attributes {dimension_semantics = [#tpu.dimension_semantics<parallel>], iteration_bounds = array<i64: 2>, scalar_prefetch = 0 : i64, scratch_operands = 0 : i64, tpu.core_type = #tpu.core_type<tc>, window_params = [{transform_indices = @transform_0, window_bounds = array<i64: 64, 128>}, {pipeline_mode = #tpu.pipeline_mode<synchronous>, transform_indices = @transform_1, window_bounds = array<i64: 128, 256>}, {pipeline_mode = #tpu.pipeline_mode<synchronous>, transform_indices = @transform_2, window_bounds = array<i64: 128, 256>}, {pipeline_mode = #tpu.pipeline_mode<synchronous>, transform_indices = @transform_3, window_bounds = array<i64: 256, 128>}, {transform_indices = @transform_4, window_bounds = array<i64: 64, 128>}]} {
    %c0 = arith.constant 0 : index
    %c0_0 = arith.constant 0 : index
    %0 = vector.load %arg1[%c0, %c0_0] : memref<64x128xbf16, #tpu.memory_space<vmem>>, vector<64x128xbf16>
    %1 = arith.extf %0 : vector<64x128xbf16> to vector<64x128xf32>
    %cst = arith.constant dense<0.000000e+00> : vector<64xf32>
    %2 = vector.multi_reduction <add>, %1, %cst [1] : vector<64x128xf32> to vector<64xf32>
    %3 = vector.shape_cast %2 : vector<64xf32> to vector<64x1xf32>
    %cst_1 = arith.constant 1.280000e+02 : f32
    %4 = vector.broadcast %cst_1 : f32 to vector<64x1xf32>
    %5 = arith.divf %3, %4 : vector<64x1xf32>
    %6 = arith.mulf %1, %1 : vector<64x128xf32>
    %cst_2 = arith.constant dense<0.000000e+00> : vector<64xf32>
    %7 = vector.multi_reduction <add>, %6, %cst_2 [1] : vector<64x128xf32> to vector<64xf32>
    %8 = vector.shape_cast %7 : vector<64xf32> to vector<64x1xf32>
    %cst_3 = arith.constant 1.280000e+02 : f32
    %9 = vector.broadcast %cst_3 : f32 to vector<64x1xf32>
    %10 = arith.divf %8, %9 : vector<64x1xf32>
    %11 = arith.mulf %5, %5 : vector<64x1xf32>
    %12 = arith.subf %10, %11 : vector<64x1xf32>
    %cst_4 = arith.constant 0.000000e+00 : f32
    %13 = vector.broadcast %cst_4 : f32 to vector<64x1xf32>
    %14 = arith.maximumf %12, %13 : vector<64x1xf32>
    %15 = vector.broadcast %5 : vector<64x1xf32> to vector<64x128xf32>
    %16 = arith.subf %1, %15 : vector<64x128xf32>
    %cst_5 = arith.constant 1.000000e-07 : f32
    %17 = vector.broadcast %cst_5 : f32 to vector<64x1xf32>
    %18 = arith.addf %14, %17 : vector<64x1xf32>
    %19 = math.rsqrt %18 : vector<64x1xf32>
    %20 = vector.broadcast %19 : vector<64x1xf32> to vector<64x128xf32>
    %21 = arith.mulf %16, %20 : vector<64x128xf32>
    %22 = arith.truncf %21 : vector<64x128xf32> to vector<64x128xbf16>
    %c0_6 = arith.constant 0 : index
    %c0_7 = arith.constant 0 : index
    %23 = vector.load %arg2[%c0_6, %c0_7] : memref<128x256xbf16, #tpu.memory_space<vmem>>, vector<128x256xbf16>
    %cst_8 = arith.constant dense<0.000000e+00> : vector<64x256xf32>
    %24 = tpu.matmul %22, %23, %cst_8 {dimension_numbers = #tpu.dot_dimension_numbers<[1], [0], [0], [1], [0, 0, 1, 1], [], []>} : vector<64x128xbf16>, vector<128x256xbf16>, vector<64x256xf32> -> vector<64x256xf32>
    %c0_9 = arith.constant 0 : index
    %c0_10 = arith.constant 0 : index
    %25 = vector.load %arg3[%c0_9, %c0_10] : memref<128x256xbf16, #tpu.memory_space<vmem>>, vector<128x256xbf16>
    %cst_11 = arith.constant dense<0.000000e+00> : vector<64x256xf32>
    %26 = tpu.matmul %22, %25, %cst_11 {dimension_numbers = #tpu.dot_dimension_numbers<[1], [0], [0], [1], [0, 0, 1, 1], [], []>} : vector<64x128xbf16>, vector<128x256xbf16>, vector<64x256xf32> -> vector<64x256xf32>
    %27 = arith.truncf %24 : vector<64x256xf32> to vector<64x256xbf16>
    %28 = arith.truncf %26 : vector<64x256xf32> to vector<64x256xbf16>
    %cst_12 = arith.constant 5.000000e-01 : bf16
    %29 = vector.broadcast %cst_12 : bf16 to vector<64x256xbf16>
    %30 = arith.mulf %29, %28 : vector<64x256xbf16>
    %cst_13 = arith.constant 4.467770e-02 : bf16
    %31 = vector.broadcast %cst_13 : bf16 to vector<64x256xbf16>
    %32 = arith.mulf %31, %28 : vector<64x256xbf16>
    %33 = arith.mulf %32, %28 : vector<64x256xbf16>
    %34 = arith.mulf %33, %28 : vector<64x256xbf16>
    %35 = arith.addf %28, %34 : vector<64x256xbf16>
    %cst_14 = arith.constant 7.968750e-01 : bf16
    %36 = vector.broadcast %cst_14 : bf16 to vector<64x256xbf16>
    %37 = arith.mulf %36, %35 : vector<64x256xbf16>
    %38 = math.tanh %37 : vector<64x256xbf16>
    %cst_15 = arith.constant 1.000000e+00 : bf16
    %39 = vector.broadcast %cst_15 : bf16 to vector<64x256xbf16>
    %40 = arith.addf %39, %38 : vector<64x256xbf16>
    %41 = arith.mulf %30, %40 : vector<64x256xbf16>
    %42 = arith.mulf %27, %41 : vector<64x256xbf16>
    %43 = arith.extf %42 : vector<64x256xbf16> to vector<64x256xf32>
    %cst_16 = arith.constant dense<0.000000e+00> : vector<64xf32>
    %44 = vector.multi_reduction <add>, %43, %cst_16 [1] : vector<64x256xf32> to vector<64xf32>
    %45 = vector.shape_cast %44 : vector<64xf32> to vector<64x1xf32>
    %cst_17 = arith.constant 2.560000e+02 : f32
    %46 = vector.broadcast %cst_17 : f32 to vector<64x1xf32>
    %47 = arith.divf %45, %46 : vector<64x1xf32>
    %48 = arith.mulf %43, %43 : vector<64x256xf32>
    %cst_18 = arith.constant dense<0.000000e+00> : vector<64xf32>
    %49 = vector.multi_reduction <add>, %48, %cst_18 [1] : vector<64x256xf32> to vector<64xf32>
    %50 = vector.shape_cast %49 : vector<64xf32> to vector<64x1xf32>
    %cst_19 = arith.constant 2.560000e+02 : f32
    %51 = vector.broadcast %cst_19 : f32 to vector<64x1xf32>
    %52 = arith.divf %50, %51 : vector<64x1xf32>
    %53 = arith.mulf %47, %47 : vector<64x1xf32>
    %54 = arith.subf %52, %53 : vector<64x1xf32>
    %cst_20 = arith.constant 0.000000e+00 : f32
    %55 = vector.broadcast %cst_20 : f32 to vector<64x1xf32>
    %56 = arith.maximumf %54, %55 : vector<64x1xf32>
    %57 = vector.broadcast %47 : vector<64x1xf32> to vector<64x256xf32>
    %58 = arith.subf %43, %57 : vector<64x256xf32>
    %cst_21 = arith.constant 1.000000e-07 : f32
    %59 = vector.broadcast %cst_21 : f32 to vector<64x1xf32>
    %60 = arith.addf %56, %59 : vector<64x1xf32>
    %61 = math.rsqrt %60 : vector<64x1xf32>
    %62 = vector.broadcast %61 : vector<64x1xf32> to vector<64x256xf32>
    %63 = arith.mulf %58, %62 : vector<64x256xf32>
    %64 = arith.truncf %63 : vector<64x256xf32> to vector<64x256xbf16>
    %c0_22 = arith.constant 0 : index
    %c0_23 = arith.constant 0 : index
    %65 = vector.load %arg4[%c0_22, %c0_23] : memref<256x128xbf16, #tpu.memory_space<vmem>>, vector<256x128xbf16>
    %cst_24 = arith.constant dense<0.000000e+00> : vector<64x128xf32>
    %66 = tpu.matmul %64, %65, %cst_24 {dimension_numbers = #tpu.dot_dimension_numbers<[1], [0], [0], [1], [0, 0, 1, 1], [], []>} : vector<64x256xbf16>, vector<256x128xbf16>, vector<64x128xf32> -> vector<64x128xf32>
    %c0_25 = arith.constant 0 : index
    %c0_26 = arith.constant 0 : index
    %67 = vector.load %arg5[%c0_25, %c0_26] : memref<64x128xf32, #tpu.memory_space<vmem>>, vector<64x128xf32>
    tpu.vector_store %arg5[%c0_25, %c0_26], %66 {strides = array<i32>} : memref<64x128xf32, #tpu.memory_space<vmem>>, vector<64x128xf32>,
    return
  }
  func.func @transform_0(%arg0: i32) -> (i32, i32) {
    %c0_i32 = arith.constant 0 : i32
    %c0_i32_0 = arith.constant 0 : i32
    return %arg0, %c0_i32 : i32, i32
  }
  func.func @transform_1(%arg0: i32) -> (i32, i32) {
    %c0_i32 = arith.constant 0 : i32
    %c0_i32_0 = arith.constant 0 : i32
    %c0_i32_1 = arith.constant 0 : i32
    return %c0_i32, %c0_i32_0 : i32, i32
  }
  func.func @transform_2(%arg0: i32) -> (i32, i32) {
    %c0_i32 = arith.constant 0 : i32
    %c0_i32_0 = arith.constant 0 : i32
    %c0_i32_1 = arith.constant 0 : i32
    return %c0_i32, %c0_i32_0 : i32, i32
  }
  func.func @transform_3(%arg0: i32) -> (i32, i32) {
    %c0_i32 = arith.constant 0 : i32
    %c0_i32_0 = arith.constant 0 : i32
    %c0_i32_1 = arith.constant 0 : i32
    return %c0_i32, %c0_i32_0 : i32, i32
  }
  func.func @transform_4(%arg0: i32) -> (i32, i32) {
    %c0_i32 = arith.constant 0 : i32
    %c0_i32_0 = arith.constant 0 : i32
    return %arg0, %c0_i32 : i32, i32
  }
}

</mosaic_0001>

<bundles_post_ra>
// kernel: tpu_custom_call.1
= control target key start
LH: loop header
LB: loop body
LE: loop exit
PB: predicated region body
PF: predicated region fallthrough
CT: control target
= control target key end

     0   :  { %9 = vsyncpa [#allocation3], 0  ;;  %s3278_s0 = inlined_call_operand.hbm [shape: bf16[128,128], index: 0, kind: input, shape index: {}]   ;;  %s3279_s1 = inlined_call_operand.hbm [shape: bf16[128,256], index: 1, kind: input, shape index: {}]   ;;  %s3280_s2 = inlined_call_operand.hbm [shape: bf16[128,256], index: 2, kind: input, shape index: {}]   ;;  %s3281_s3 = inlined_call_operand.hbm [shape: bf16[256,128], index: 3, kind: input, shape index: {}]   ;;  %s3282_s4 = inlined_call_operand.hbm [shape: f32[128,128], index: 4, kind: output, shape index: {}]  }
   0x1   :  { %11 = vsyncpa [#allocation3 + $0x1], 0 }
   0x2   :  { %12 = vsyncpa [#allocation6], 0 }
   0x3   :  { %13 = vsyncpa [#allocation9], 0 }
   0x4   :  { %14 = vsyncpa [#allocation4], 0 }
   0x5   :  { %16 = vsyncpa [#allocation4 + $0x1], 0  ;;  %s2470_s15 = smov 0   ;;  %s2472_s16 = smov 0  }
   0x6   :  { %s2474_s17 = smov 0   ;;  %s2476_s18 = smov 0  }
   0x7 LB: > { %s2491_s19 = sadd.s32 4294967295, %s2432_s18   ;;  %s1788_s20 = sadd.s32 4294967294, %s2432_s18   ;;  %s2432_s18 = sphi %s2476_s18, %s3309_s18   ;;  %s2428_s17 = sphi %s2474_s17, %s3308_s17   ;;  %s2424_s16 = sphi %s2472_s16, %s3307_s16   ;;  %s2420_s15 = sphi %s2470_s15, %s3306_s15  }
   0x8   : > { %p42_p0 = scmp.ne.s32.totalorder %s2424_s16, %s2420_s15  ;;  %p43_p1 = scmp.eq.s32.totalorder %s2491_s19, 0 }
   0x9   : > { %p129_p2 = scmp.eq.s32.totalorder %s2491_s19, 1  ;;  %p135_p3 = scmp.eq.s32.totalorder %s1788_s20, 1 }
   0xa   : > { %p2500_p4 = por %p43_p1, %p42_p0  ;;  %p1789_p5 = scmp.ge.s32.totalorder %s2432_s18, 1 }
   0xb   : > { %p2505_p6 = por %p135_p3, %p42_p0  ;;  %p142_p7 = scmp.lt.s32.totalorder %s2432_s18, 3 }
   0xc   : > { %s153_s25 = sshll.u32 %s3279_s1, 4  ;;  %s2434_s27 = smov [#allocation5]   ;;  %s154_s25 = int_to_ptr.hbm [resolvable:$true] %s153_s25 }
   0xd   : > { %p2513_p8 = pnand %p1789_p5, %p142_p7  ;;  %s155_s28 = sshll.u32 %s2434_s27, 4  ;;  %s156_s28 = int_to_ptr.vmem [resolvable:$true] %s155_s28 }
   0xe   : > { %s167_s6 = sshll.u32 %s3280_s2, 4  ;;  %s2435_s7 = smov 128   ;;  %s168_s6 = int_to_ptr.hbm [resolvable:$true] %s167_s6 }
   0xf   : > { %p2101_p9 = pneg %p2513_p8  ;;  %s2436_s8 = smov 8  }
  0x10   : > { %s2437_s9 = smov [#allocation7]   ;;  %s181_s13 = sshll.u32 %s3281_s3, 4  ;;  %s182_s13 = int_to_ptr.hbm [resolvable:$true] %s181_s13 }
  0x11   : > { %p2521_p10 = pnand %p2101_p9, %p43_p1  ;;  %s169_s10 = sshll.u32 %s2437_s9, 4  ;;  %s170_s10 = int_to_ptr.vmem [resolvable:$true] %s169_s10 }
  0x12   : > { %s2438_s14 = smov [#allocation8]   ;;  %s2439_s23 = smov 64  }
  0x13   : > { %2104 = dma.hbm_to_vmem [thread:$0]  (!%p2521_p10), %s154_s25, 2048, %s156_s28, [#allocation6], %s2435_s7, %s2435_s7, %s2436_s8  }
  0x14   : > { %2107 = dma.hbm_to_vmem [thread:$0]  (!%p2521_p10), %s168_s6, 2048, %s170_s10, [#allocation6], %s2435_s7, %s2435_s7, %s2436_s8  }
  0x15   : > { %s183_s20 = sshll.u32 %s2438_s14, 4  ;;  %s2440_s24 = smov 4   ;;  %s184_s20 = int_to_ptr.vmem [resolvable:$true] %s183_s20 }
  0x16   : > { %2110 = dma.hbm_to_vmem [thread:$0]  (!%p2521_p10), %s182_s13, 2048, %s184_s20, [#allocation9], %s2439_s23, %s2439_s23, %s2440_s24  }
  0x17   : > { %s2542_s25 = sadd.s32 1, %s2432_s18   ;;  %s29_s28 = sadd.s32 1, %s2428_s17 }
  0x18   : > { %s26_s27 = ssub.s32 %s2432_s18, %s2542_s25  ;;  %p36_p13 = scmp.ne.s32.totalorder %s2428_s17, %s2424_s16 }
  0x19   : > { %p27_p12 = scmp.eq.s32.totalorder %s26_s27, 0  ;;  %p37_p0 = scmp.eq.s32.totalorder %s2432_s18, 0 }
  0x1a   : > { %p2555_p3 = por %p129_p2, %p36_p13  ;;  %p2122_p5 = scmp.lt.s32.totalorder %s2432_s18, 2 }
  0x1b   : > { %s2551_s30 = scalar_select %p27_p12, %s2428_s17, %s29_s28  }
  0x1c   : > { %s197_s29 = sand.u32 1, %s2428_s17   ;;  %s2000_s6 = sshll.u32 %s2432_s18, 5 }
  0x1d   : > { %p38_p7 = por %p37_p0, %p36_p13  ;;  %s1794_s7 = sshll.u32 %s197_s29, 5 }
  0x1e   : > { %s206_s10 = scalar_lea.hbm %s3278_s0, %s2000_s6  ;;  %s201_s12 = scalar_lea.vmem [#allocation2], %s1794_s7 }
  0x1f   : > { %s207_s11 = sshll.u32 %s206_s10, 4  ;;  %s209_s13 = sshll.u32 %s201_s12, 4  ;;  %s208_s11 = int_to_ptr.hbm [resolvable:$true] %s207_s11  ;;  %s210_s13 = int_to_ptr.vmem [resolvable:$true] %s209_s13 }
  0x20   : > { %p2565_p9 = pnand %p2122_p5, %p38_p7  ;;  %s198_s20 = scalar_lea.sflag [#allocation3], %s197_s29 }
  0x21   : > { %s2328_s27 = sshra.s32 %s208_s11, 4  ;;  %s2335_s7 = scalar_lea.hbm %s3278_s0, 64  ;;  %s2329_s27 = int_to_ptr.hbm [resolvable:$true] %s2328_s27 }
  0x22   : > { %s2330_s28 = scalar_lea.hbm %s2329_s27, 32  ;;  %p2332_p10 = pneg %p2565_p9 }
  0x23   : > { %p2331_p2 = scmp.ne.s32.totalorder %s2329_s27, %s2330_s28  ;;  %p2336_p0 = scmp.lt.s32.totalorder %s2329_s27, %s3278_s0 }
  0x24   : > { %p2337_p5 = scmp.lt.s32.totalorder %s2335_s7, %s2330_s28 }
  0x25   : > { %p2333_p12 = pnand %p2332_p10, %p2331_p2 }
  0x26   : > { %p2338_p7 = por %p2337_p5, %p2336_p0 }
  0x27   : > { %p2334_p13 = pneg %p2333_p12 }
  0x29   : > { %p2339_p11 = pnand %p2338_p7, %p2334_p13 }
  0x2b   : > { %2342 = shalt.err (!%p2339_p11)
}
  0x2c   : > { %2114 = dma.hbm_to_vmem [thread:$0]  (!%p2565_p9), %s208_s11, 512, %s210_s13, %s198_s20, %s2439_s23, %s2439_s23, %s2440_s24  }
  0x2d   : > { %221 = sbr.rel (%p2513_p8) target bundleno = 813 (0x32d), region = 36  ;;  %s2585_s29 = sand.u32 (!%p2513_p8), 1, %s2424_s16  }
  0x2e   : > { %s1798_s12 = sshll.u32 (!%p2513_p8), %s2585_s29, 5  ;;  %s224_s27 = scalar_lea.sflag (!%p2513_p8), [#allocation3], %s2585_s29 }
  0x2f   : > { %s227_s28 = scalar_lea.vmem (!%p2513_p8), [#allocation2], %s1798_s12 }
  0x32   : > { %2403 = dma.done.wait (%p2500_p4), %s224_s27, 512  }
  0x33   : > { %2405 = vsyncadd (%p2500_p4), %s224_s27, 4294966784 }
  0x34   : > { %2407 = dma.done.wait (%p43_p1), [#allocation6], 4096  }
  0x35   : > { %2409 = vsyncadd (%p43_p1), [#allocation6], 4294963200 }
  0x36   : > { %2411 = dma.done.wait (%p43_p1), [#allocation9], 2048  }
  0x37   : > { %2413 = vsyncadd (%p43_p1), [#allocation9], 4294965248  ;;  %v2067_v0 = vld [vmem:[%s227_s28 + $0x10] sm:$0xff]   ;;  %v2068_v1 = vld [vmem:[%s227_s28 + $0x18] sm:$0xff]   ;;  %v2441_v20 = vmov 128.0   ;;  %s1802_s21 = sshll.u32 %s2585_s29, 6 }
  0x38   : > { %v2601_v2 = vunpack.c.l.bf16 %v2067_v0  ;;  %v2603_v3 = vunpack.c.l.bf16 %v2068_v1  ;;  %v2609_v5 = vunpack.c.h.bf16 %v2067_v0  ;;  %v2611_v6 = vunpack.c.h.bf16 %v2068_v1  ;;  %v2051_v8 = vld [vmem:[%s227_s28] sm:$0xff]   ;;  %v2066_v14 = vld [vmem:[%s227_s28 + $0x8] sm:$0xff]   ;;  %v1861_v21 = vld [vmem:[#allocation5 + $0x70] sm:$0xf]  ;;  %s3234_s26 = scalar_lea.vmem [#allocation10], %s1802_s21  ;;  %s2049_s23 = sshll.u32 %s2491_s19, 6 }
  0x39   : > { %v2619_v10 = vunpack.c.l.bf16 %v2051_v8  ;;  %v2624_v12 = vunpack.c.h.bf16 %v2051_v8  ;;  %v2631_v16 = vunpack.c.l.bf16 %v2066_v14  ;;  %v2635_v18 = vunpack.c.h.bf16 %v2066_v14  ;;  %v2016_v22 = vld [vmem:[#allocation5 + $0x74] sm:$0xf0]  ;;  %v2015_v23 = vld [vmem:[#allocation5 + $0x74] sm:$0xf]  ;;  %v1863_v25 = vld [vmem:[#allocation5 + $0x78] sm:$0xf0]  ;;  %s1682_s13 = scalar_lea.hbm %s3282_s4, %s2049_s23 }
  0x3a   : > { %294 = vadd.xlane.f32.xlu0 %v2601_v2  ;;  %298 = vadd.xlane.f32.xlu2 %v2603_v3  ;;  %v321_v4 = vmul.f32 %v2601_v2, %v2601_v2  ;;  %v322_v7 = vmul.f32 %v2609_v5, %v2609_v5  ;;  %v323_v9 = vmul.f32 %v2603_v3, %v2603_v3  ;;  %2170 = vrcp.f32 %v2441_v20  ;;  %v1853_v28 = vld [vmem:[#allocation5 + $0x60] sm:$0xf]  ;;  %v2014_v29 = vld [vmem:[#allocation5 + $0x64] sm:$0xf0]  ;;  %v2013_v30 = vld [vmem:[#allocation5 + $0x64] sm:$0xf] }
  0x3b   : > { %v324_v11 = vmul.f32 %v2611_v6, %v2611_v6  ;;  %v318_v13 = vmul.f32 %v2624_v12, %v2624_v12  ;;  %v317_v15 = vmul.f32 %v2619_v10, %v2619_v10  ;;  %v319_v17 = vmul.f32 %v2631_v16, %v2631_v16  ;;  %v1855_v32 = vld [vmem:[#allocation5 + $0x68] sm:$0xf0]  ;;  %v1845_v35 = vld [vmem:[#allocation5 + $0x50] sm:$0xf]  ;;  %v2012_v36 = vld [vmem:[#allocation5 + $0x54] sm:$0xf0] }
  0x3c   : > { %333 = vadd.xlane.f32.xlu1 %v321_v4  ;;  %v320_v19 = vmul.f32 %v2635_v18, %v2635_v18  ;;  %v1862_v24 = vor.u32 %v2016_v22, %v1861_v21  ;;  %v1866_v26 = vor.u32 %v2015_v23, %v1863_v25  ;;  %v1854_v31 = vor.u32 %v2014_v29, %v1853_v28  ;;  %v2011_v37 = vld [vmem:[#allocation5 + $0x54] sm:$0xf]  ;;  %v1847_v39 = vld [vmem:[#allocation5 + $0x58] sm:$0xf0]  ;;  %v1837_v42 = vld [vmem:[#allocation5 + $0x40] sm:$0xf] }
  0x3d   : > { %v1858_v34 = vor.u32 %v2013_v30, %v1855_v32  ;;  %v1846_v38 = vor.u32 %v2012_v36, %v1845_v35  ;;  %v1850_v41 = vor.u32 %v2011_v37, %v1847_v39  ;;  %v2010_v43 = vld [vmem:[#allocation5 + $0x44] sm:$0xf0]  ;;  %v2009_v44 = vld [vmem:[#allocation5 + $0x44] sm:$0xf]  ;;  %v1839_v46 = vld [vmem:[#allocation5 + $0x48] sm:$0xf0] }
  0x3e   : > { %2069 = vmatpush.bf16.msra.mxu2 %v1862_v24  ;;  %577 = vmatpush.bf16.msra.mxu0 %v1862_v24  ;;  %v1838_v45 = vor.u32 %v2010_v43, %v1837_v42  ;;  %v1842_v48 = vor.u32 %v2009_v44, %v1839_v46  ;;  %v1829_v49 = vld [vmem:[#allocation5 + $0x30] sm:$0xf]  ;;  %v2008_v50 = vld [vmem:[#allocation5 + $0x34] sm:$0xf0]  ;;  %v2007_v51 = vld [vmem:[#allocation5 + $0x34] sm:$0xf] }
  0x3f   : > { %2077 = vmatpush.bf16.msra.mxu3 %v1866_v26  ;;  %606 = vmatpush.bf16.msra.mxu1 %v1866_v26  ;;  %v1830_v52 = vor.u32 %v2008_v50, %v1829_v49  ;;  %v1831_v53 = vld [vmem:[#allocation5 + $0x38] sm:$0xf0]  ;;  %v1821_v56 = vld [vmem:[#allocation5 + $0x20] sm:$0xf]  ;;  %v2006_v57 = vld [vmem:[#allocation5 + $0x24] sm:$0xf0] }
  0x40   : > { %v2171_v27 = vpop.eup %2170  ;;  %v1834_v55 = vor.u32 %v2007_v51, %v1831_v53  ;;  %v2005_v58 = vld [vmem:[#allocation5 + $0x24] sm:$0xf]  ;;  %v1822_v60 = vor.u32 %v2006_v57, %v1821_v56  ;;  %v1823_v61 = vld [vmem:[#allocation5 + $0x28] sm:$0xf0]  ;;  %v1813_v4 = vld [vmem:[#allocation5 + $0x10] sm:$0xf] }
  0x41   : > { %v303_v33 = vmul.f32 128.0, %v2171_v27  ;;  %vm307_vm0 = vweird.f32 %v2171_v27  ;;  %v1826_v62 = vor.u32 %v2005_v58, %v1823_v61  ;;  %v2003_v8 = vld [vmem:[#allocation5 + $0x14] sm:$0xf]  ;;  %v2002_v20 = vld [vmem:[#allocation5 + $0x4] sm:$0xf0]  ;;  %s1683_s14 = sshll.u32 %s3234_s26, 4  ;;  %s1684_s14 = int_to_ptr.vmem [resolvable:$true] %s1683_s14 }
  0x42   : > { %296 = vadd.xlane.f32.xlu0 %v2609_v5  ;;  %300 = vadd.xlane.f32.xlu2 %v2611_v6  ;;  %v2001_v21 = vld [vmem:[#allocation5 + $0x4] sm:$0xf]  ;;  %v1807_v24 = vld [vmem:[#allocation5 + $0x8] sm:$0xf0]  ;;  %v1925_v30 = vld [vmem:[#allocation7 + $0x70] sm:$0xf] }
  0x43   : > { %2070 = vmatpush.bf16.msra.mxu2 %v1854_v31  ;;  %578 = vmatpush.bf16.msra.mxu0 %v1854_v31  ;;  %v304_v40 = vsub.f32 1.0, %v303_v33  ;;  %v1810_v25 = vor.u32 %v2001_v21, %v1807_v24  ;;  %v2032_v31 = vld [vmem:[#allocation7 + $0x74] sm:$0xf0]  ;;  %v2031_v32 = vld [vmem:[#allocation7 + $0x74] sm:$0xf]  ;;  %s1685_s20 = sshll.u32 %s1682_s13, 4  ;;  %s1686_s20 = int_to_ptr.hbm [resolvable:$true] %s1685_s20 }
  0x44   : > { %335 = vadd.xlane.f32.xlu1 %v322_v7  ;;  %2078 = vmatpush.bf16.msra.mxu3 %v1858_v34  ;;  %v2004_v7 = vld [vmem:[#allocation5 + $0x14] sm:$0xf0]  ;;  %v1926_v35 = vor.u32 %v2032_v31, %v1925_v30  ;;  %v1927_v36 = vld [vmem:[#allocation7 + $0x78] sm:$0xf0]  ;;  %v1917_v42 = vld [vmem:[#allocation7 + $0x60] sm:$0xf] }
  0x45   : > { %607 = vmatpush.bf16.msra.mxu1 %v1858_v34  ;;  %v305_v47 = vmul.f32 %v2171_v27, %v304_v40  ;;  %v1930_v40 = vor.u32 %v2031_v32, %v1927_v36  ;;  %v2030_v43 = vld [vmem:[#allocation7 + $0x64] sm:$0xf0]  ;;  %v2029_v44 = vld [vmem:[#allocation7 + $0x64] sm:$0xf]  ;;  %v2028_v56 = vld [vmem:[#allocation7 + $0x54] sm:$0xf0] }
  0x46   : > { %v1918_v46 = vor.u32 %v2030_v43, %v1917_v42  ;;  %v1903_v21 = vld [vmem:[#allocation7 + $0x48] sm:$0xf0]  ;;  %v1893_v36 = vld [vmem:[#allocation7 + $0x30] sm:$0xf]  ;;  %v1895_v43 = vld [vmem:[#allocation7 + $0x38] sm:$0xf0] }
  0x47   : > { %2071 = vmatpush.bf16.msra.mxu2 %v1846_v38  ;;  %579 = vmatpush.bf16.msra.mxu0 %v1846_v38  ;;  %v306_v54 = vadd.f32 %v2171_v27, %v305_v47  ;;  %v1919_v47 = vld [vmem:[#allocation7 + $0x68] sm:$0xf0]  ;;  %s1671_s6 = scalar_lea.sflag [#allocation4], %s2585_s29  ;;  %s2372_s8 = sshra.s32 %s1686_s20, 4  ;;  %s2373_s8 = int_to_ptr.hbm [resolvable:$true] %s2372_s8 }
  0x48   : > { %2079 = vmatpush.bf16.msra.mxu3 %v1850_v41  ;;  %v1922_v49 = vor.u32 %v2029_v44, %v1919_v47  ;;  %s2374_s7 = scalar_lea.hbm %s2373_s8, 64  ;;  %s2378_s10 = scalar_lea.hbm %s3282_s4, 128 }
  0x49   : > { %608 = vmatpush.bf16.msra.mxu1 %v1850_v41  ;;  %v2641_v59 = vsel %vm307_vm0, %v2171_v27, %v306_v54  ;;  %p2375_p1 = scmp.ne.s32.totalorder %s2373_s8, %s2374_s7  ;;  %p2379_p11 = scmp.lt.s32.totalorder %s2373_s8, %s3282_s4 }
  0x4a   : > { %337 = vadd.xlane.f32.xlu0 %v323_v9  ;;  %286 = vadd.xlane.f32.xlu2 %v2619_v10  ;;  %p2380_p9 = scmp.lt.s32.totalorder %s2378_s10, %s2374_s7 }
  0x4b   : > { %2072 = vmatpush.bf16.msra.mxu2 %v1838_v45  ;;  %580 = vmatpush.bf16.msra.mxu0 %v1838_v45  ;;  %p2376_p4 = pnand %p2375_p1, %p2555_p3 }
  0x4c   : > { %339 = vadd.xlane.f32.xlu1 %v324_v11  ;;  %2080 = vmatpush.bf16.msra.mxu3 %v1842_v48  ;;  %v1814_v11 = vor.u32 %v2004_v7, %v1813_v4  ;;  %p2381_p2 = por %p2380_p9, %p2379_p11 }
  0x4d   : > { %609 = vmatpush.bf16.msra.mxu1 %v1842_v48  ;;  %p2377_p8 = pneg %p2376_p4 }
  0x4f   : > { %2073 = vmatpush.bf16.msra.mxu2 %v1830_v52  ;;  %581 = vmatpush.bf16.msra.mxu0 %v1830_v52  ;;  %p2382_p10 = pnand %p2381_p2, %p2377_p8 }
  0x50   : > { %2081 = vmatpush.bf16.msra.mxu3 %v1834_v55 }
  0x51   : > { %610 = vmatpush.bf16.msra.mxu1 %v1834_v55  ;;  %v1909_v55 = vld [vmem:[#allocation7 + $0x50] sm:$0xf] }
  0x52   : > { %288 = vadd.xlane.f32.xlu0 %v2624_v12  ;;  %327 = vadd.xlane.f32.xlu2 %v318_v13  ;;  %v1815_v13 = vld [vmem:[#allocation5 + $0x18] sm:$0xf0]  ;;  %v1910_v61 = vor.u32 %v2028_v56, %v1909_v55 }
  0x53   : > { %2074 = vmatpush.bf16.msra.mxu2 %v1822_v60  ;;  %582 = vmatpush.bf16.msra.mxu0 %v1822_v60 }
  0x54   : > { %325 = vadd.xlane.f32.xlu1 %v317_v15  ;;  %2082 = vmatpush.bf16.msra.mxu3 %v1826_v62 }
  0x55   : > { %611 = vmatpush.bf16.msra.mxu1 %v1826_v62  ;;  %v2027_v62 = vld [vmem:[#allocation7 + $0x54] sm:$0xf] }
  0x57   : > { %2075 = vmatpush.bf16.msra.mxu2 %v1814_v11  ;;  %583 = vmatpush.bf16.msra.mxu0 %v1814_v11 }
  0x5a   : > { %290 = vadd.xlane.f32.xlu0 %v2631_v16  ;;  %329 = vadd.xlane.f32.xlu2 %v319_v17  ;;  %v1818_v17 = vor.u32 %v2003_v8, %v1815_v13 }
  0x5c   : > { %292 = vadd.xlane.f32.xlu1 %v2635_v18  ;;  %2083 = vmatpush.bf16.msra.mxu3 %v1818_v17 }
  0x5d   : > { %612 = vmatpush.bf16.msra.mxu1 %v1818_v17 }
  0x60   : > { %2084 = vmatpush.bf16.msra.mxu3 %v1810_v25 }
  0x61   : > { %613 = vmatpush.bf16.msra.mxu1 %v1810_v25 }
  0x62   : > { %331 = vadd.xlane.f32.xlu0 %v320_v19  ;;  %v1805_v19 = vld [vmem:[#allocation5] sm:$0xf] }
  0x63   : > { %v1806_v23 = vor.u32 %v2002_v20, %v1805_v19  ;;  %v2025_v20 = vld [vmem:[#allocation7 + $0x44] sm:$0xf] }
  0x64   : > { %760 = vmatpush.bf16.msrb.mxu3 %v1930_v40  ;;  %v1906_v25 = vor.u32 %v2025_v20, %v1903_v21 }
  0x65   : > { %2076 = vmatpush.bf16.msra.mxu2 %v1806_v23  ;;  %584 = vmatpush.bf16.msra.mxu0 %v1806_v23 }
  0x68   : > { %761 = vmatpush.bf16.msrb.mxu3 %v1922_v49 }
  0x69   : > { %731 = vmatpush.bf16.msrb.mxu2 %v1926_v35 }
  0x6d   : > { %732 = vmatpush.bf16.msrb.mxu2 %v1918_v46 }
  0x71   : > { %733 = vmatpush.bf16.msrb.mxu2 %v1910_v61  ;;  %v1887_v61 = vld [vmem:[#allocation7 + $0x28] sm:$0xf0] }
  0xad   : > { %v295_v63 = vpop.xlane.xlu0 %294  ;;  %v299_v0 = vpop.xlane.xlu2 %298 }
  0xae   : > { %v2644_v1 = vmul.f32 %v2641_v59, %v295_v63  ;;  %v2655_v37 = vmul.f32 %v2641_v59, %v299_v0  ;;  %v1911_v63 = vld [vmem:[#allocation7 + $0x58] sm:$0xf0] }
  0xaf   : > { %v334_v9 = vpop.xlane.xlu1 %333  ;;  %v1914_v13 = vor.u32 %v2027_v62, %v1911_v63 }
  0xb0   : > { %v353_v14 = vmul.f32 %v2644_v1, %v2644_v1  ;;  %v345_v15 = vmul.f32 %v334_v9, %v2641_v59  ;;  %v355_v48 = vmul.f32 %v2655_v37, %v2655_v37 }
  0xb1   : > { %762 = vmatpush.bf16.msrb.mxu3 %v1914_v13 }
  0xb2   : > { %v361_v22 = vsub.f32 %v345_v15, %v353_v14  ;;  %v1901_v14 = vld [vmem:[#allocation7 + $0x40] sm:$0xf]  ;;  %v2026_v15 = vld [vmem:[#allocation7 + $0x44] sm:$0xf0] }
  0xb3   : > { %v1902_v19 = vor.u32 %v2026_v15, %v1901_v14  ;;  %v377_v15 = vsub.f32 %v2601_v2, %v2644_v1  ;;  %v1877_v1 = vld [vmem:[#allocation7 + $0x10] sm:$0xf] }
  0xb4   : > { %v369_v26 = vmax.f32 %v361_v22, 0.0 }
  0xb5   : > { %v297_v27 = vpop.xlane.xlu0 %296  ;;  %v301_v28 = vpop.xlane.xlu2 %300  ;;  %734 = vmatpush.bf16.msrb.mxu2 %v1902_v19  ;;  %763 = vmatpush.bf16.msrb.mxu3 %v1906_v25 }
  0xb6   : > { %v2650_v29 = vmul.f32 %v2641_v59, %v297_v27  ;;  %v2652_v33 = vadd.f32 1e-07, %v369_v26  ;;  %v2662_v41 = vmul.f32 %v2641_v59, %v301_v28 }
  0xb7   : > { %v336_v34 = vpop.xlane.xlu1 %335 }
  0xb8   : > { %v354_v38 = vmul.f32 %v2650_v29, %v2650_v29  ;;  %2172 = vrsqrt.f32 %v2652_v33  ;;  %v346_v39 = vmul.f32 %v336_v34, %v2641_v59  ;;  %v356_v53 = vmul.f32 %v2662_v41, %v2662_v41 }
  0xb9   : > { %vm435_vm3 = vweird.f32 %v2652_v33 }
  0xba   : > { %v362_v45 = vsub.f32 %v346_v39, %v354_v38  ;;  %v2024_v38 = vld [vmem:[#allocation7 + $0x34] sm:$0xf0]  ;;  %v2023_v39 = vld [vmem:[#allocation7 + $0x34] sm:$0xf] }
  0xbb   : > { %v1894_v47 = vor.u32 %v2024_v38, %v1893_v36 }
  0xbc   : > { %v370_v50 = vmax.f32 %v362_v45, 0.0 }
  0xbd   : > { %v338_v51 = vpop.xlane.xlu0 %337  ;;  %v287_v52 = vpop.xlane.xlu2 %286  ;;  %735 = vmatpush.bf16.msrb.mxu2 %v1894_v47 }
  0xbe   : > { %v347_v54 = vmul.f32 %v338_v51, %v2641_v59  ;;  %v2669_v57 = vpop.eup %2172  ;;  %v2671_v58 = vadd.f32 1e-07, %v370_v50  ;;  %v2679_v17 = vmul.f32 %v2641_v59, %v287_v52  ;;  %v1885_v51 = vld [vmem:[#allocation7 + $0x20] sm:$0xf]  ;;  %v2022_v52 = vld [vmem:[#allocation7 + $0x24] sm:$0xf0] }
  0xbf   : > { %v340_v60 = vpop.xlane.xlu1 %339  ;;  %v430_v0 = vmul.f32 %v2669_v57, %v2652_v33  ;;  %vm436_vm1 = vweird.f32 %v2669_v57  ;;  %v2020_v33 = vld [vmem:[#allocation7 + $0x14] sm:$0xf0] }
  0xc0   : > { %v363_v4 = vsub.f32 %v347_v54, %v355_v48  ;;  %v348_v7 = vmul.f32 %v340_v60, %v2641_v59  ;;  %2174 = vrsqrt.f32 %v2671_v58  ;;  %v349_v31 = vmul.f32 %v2679_v17, %v2679_v17  ;;  %vm2723_vm4 = vmor %vm435_vm3, %vm436_vm1 }
  0xc1   : > { %v431_v8 = vmul.f32 %v2669_v57, %v430_v0  ;;  %v1898_v48 = vor.u32 %v2023_v39, %v1895_v43  ;;  %v1886_v60 = vor.u32 %v2022_v52, %v1885_v51  ;;  %vm445_vm5 = vweird.f32 %v2671_v58  ;;  %v1879_v39 = vld [vmem:[#allocation7 + $0x18] sm:$0xf0] }
  0xc2   : > { %v371_v9 = vmax.f32 %v363_v4, 0.0  ;;  %v364_v11 = vsub.f32 %v348_v7, %v356_v53  ;;  %v2021_v53 = vld [vmem:[#allocation7 + $0x24] sm:$0xf] }
  0xc3   : > { %v432_v22 = vmul.f32 0.5, %v431_v8  ;;  %764 = vmatpush.bf16.msrb.mxu3 %v1898_v48  ;;  %v1890_v14 = vor.u32 %v2021_v53, %v1887_v61  ;;  %736 = vmatpush.bf16.msrb.mxu2 %v1886_v60  ;;  %v2017_v48 = vld [vmem:[#allocation7 + $0x4] sm:$0xf] }
  0xc4   : > { %v2681_v23 = vadd.f32 1e-07, %v371_v9  ;;  %v372_v24 = vmax.f32 %v364_v11, 0.0 }
  0xc5   : > { %v289_v26 = vpop.xlane.xlu0 %288  ;;  %v328_v27 = vpop.xlane.xlu2 %327  ;;  %v433_v40 = vsub.f32 1.5, %v432_v22 }
  0xc6   : > { %2176 = vrsqrt.f32 %v2681_v23  ;;  %v2684_v28 = vadd.f32 1e-07, %v372_v24  ;;  %v2686_v30 = vpop.eup %2174  ;;  %v2691_v32 = vmul.f32 %v2641_v59, %v289_v26  ;;  %v342_v34 = vmul.f32 %v328_v27, %v2641_v59 }
  0xc7   : > { %v326_v35 = vpop.xlane.xlu1 %325  ;;  %v440_v42 = vmul.f32 %v2686_v30, %v2671_v58  ;;  %v434_v55 = vmul.f32 %v2669_v57, %v433_v40  ;;  %vm446_vm2 = vweird.f32 %v2686_v30  ;;  %765 = vmatpush.bf16.msrb.mxu3 %v1890_v14  ;;  %v1869_v40 = vld [vmem:[#allocation7] sm:$0xf]  ;;  %vm455_vm12 = vweird.f32 %v2681_v23 }
  0xc8   : > { %2178 = vrsqrt.f32 %v2684_v28  ;;  %v350_v44 = vmul.f32 %v2691_v32, %v2691_v32  ;;  %v341_v45 = vmul.f32 %v326_v35, %v2641_v59  ;;  %vm2735_vm6 = vmor %vm445_vm5, %vm446_vm2  ;;  %v378_v35 = vsub.f32 %v2609_v5, %v2650_v29  ;;  %v1871_v5 = vld [vmem:[#allocation7 + $0x8] sm:$0xf0] }
  0xc9   : > { %v441_v46 = vmul.f32 %v2686_v30, %v440_v42  ;;  %v438_v58 = vsel %vm2723_vm4, %v2669_v57, %v434_v55  ;;  %v2018_v42 = vld [vmem:[#allocation7 + $0x4] sm:$0xf0]  ;;  %v1874_v61 = vor.u32 %v2017_v48, %v1871_v5  ;;  %vm465_vm7 = vweird.f32 %v2684_v28 }
  0xca   : > { %v358_v49 = vsub.f32 %v342_v34, %v350_v44  ;;  %v357_v50 = vsub.f32 %v341_v45, %v349_v31  ;;  %v2019_v34 = vld [vmem:[#allocation7 + $0x14] sm:$0xf]  ;;  %v1878_v45 = vor.u32 %v2020_v33, %v1877_v1  ;;  %v1870_v52 = vor.u32 %v2018_v42, %v1869_v40 }
  0xcb   : > { %v442_v56 = vmul.f32 0.5, %v441_v46  ;;  %v473_v46 = vmul.f32 %v438_v58, %v377_v15  ;;  %v1882_v51 = vor.u32 %v2019_v34, %v1879_v39 }
  0xcc   : > { %v2701_v54 = vpop.eup %2176  ;;  %v366_v63 = vmax.f32 %v358_v49, 0.0  ;;  %v365_v0 = vmax.f32 %v357_v50, 0.0  ;;  %737 = vmatpush.bf16.msrb.mxu2 %v1878_v45 }
  0xcd   : > { %v450_v62 = vmul.f32 %v2701_v54, %v2681_v23  ;;  %v291_v4 = vpop.xlane.xlu0 %290  ;;  %v330_v7 = vpop.xlane.xlu2 %329  ;;  %v443_v9 = vsub.f32 1.5, %v442_v56  ;;  %766 = vmatpush.bf16.msrb.mxu3 %v1882_v51  ;;  %vm456_vm11 = vweird.f32 %v2701_v54 }
  0xce   : > { %v2708_v8 = vpop.eup %2178  ;;  %v2711_v11 = vmul.f32 %v2641_v59, %v291_v4  ;;  %v343_v13 = vmul.f32 %v330_v7, %v2641_v59  ;;  %v2719_v20 = vadd.f32 1e-07, %v366_v63  ;;  %v2729_v25 = vadd.f32 1e-07, %v365_v0  ;;  %vm457_vm1 = vmor %vm455_vm12, %vm456_vm11 }
  0xcf   : > { %v460_v19 = vmul.f32 %v2708_v8, %v2684_v28  ;;  %v293_v21 = vpop.xlane.xlu1 %292  ;;  %v444_v24 = vmul.f32 %v2686_v30, %v443_v9  ;;  %v451_v27 = vmul.f32 %v2701_v54, %v450_v62  ;;  %vm466_vm8 = vweird.f32 %v2708_v8 }
  0xd0   : > { %v351_v2 = vmul.f32 %v2711_v11, %v2711_v11  ;;  %2180 = vrsqrt.f32 %v2719_v20  ;;  %v2749_v38 = vmul.f32 %v2641_v59, %v293_v21  ;;  %738 = vmatpush.bf16.msrb.mxu2 %v1870_v52  ;;  %vm405_vm9 = vweird.f32 %v2719_v20  ;;  %vm2775_vm13 = vmor %vm465_vm7, %vm466_vm8 }
  0xd1   : > { %v461_v31 = vmul.f32 %v2708_v8, %v460_v19  ;;  %2182 = vrsqrt.f32 %v2729_v25  ;;  %v448_v44 = vsel %vm2735_vm6, %v2686_v30, %v444_v24  ;;  %v452_v29 = vmul.f32 0.5, %v451_v27  ;;  %767 = vmatpush.bf16.msrb.mxu3 %v1874_v61 }
  0xd2   : > { %v359_v36 = vsub.f32 %v343_v13, %v351_v2  ;;  %v474_v47 = vmul.f32 %v448_v44, %v378_v35  ;;  %v352_v49 = vmul.f32 %v2749_v38, %v2749_v38  ;;  %vm395_vm14 = vweird.f32 %v2729_v25 }
  0xd3   : > { %v462_v43 = vmul.f32 0.5, %v461_v31  ;;  %v453_v0 = vsub.f32 1.5, %v452_v29  ;;  %v380_v28 = vsub.f32 %v2611_v6, %v2662_v41  ;;  %v374_v31 = vsub.f32 %v2624_v12, %v2691_v32 }
  0xd4   : > { %v367_v57 = vmax.f32 %v359_v36, 0.0  ;;  %v2759_v56 = vpack.c.bf16 %v474_v47, %v473_v46  ;;  %v379_v36 = vsub.f32 %v2603_v3, %v2655_v37  ;;  %v376_v46 = vsub.f32 %v2635_v18, %v2749_v38 }
  0xd5   : > { %v332_v50 = vpop.xlane.xlu0 %331  ;;  %v463_v60 = vsub.f32 1.5, %v462_v43  ;;  %v454_v19 = vmul.f32 %v2701_v54, %v453_v0  ;;  %v375_v5 = vsub.f32 %v2631_v16, %v2711_v11 }
  0xd6   : > { %v2756_v53 = vadd.f32 1e-07, %v367_v57  ;;  %v344_v55 = vmul.f32 %v332_v50, %v2641_v59  ;;  %v2181_v30 = vpop.eup %2180  ;;  %595 = vmatmul.bf16.vlgmr.msra.gmra.mxu2 %v2759_v56  ;;  %624 = vmatmul.bf16.vlgmr.msra.gmra.mxu3 %v2759_v56 }
  0xd7   : > { %v2183_v62 = vpop.eup %2182  ;;  %v400_v63 = vmul.f32 %v2181_v30, %v2719_v20  ;;  %v464_v9 = vmul.f32 %v2708_v8, %v463_v60  ;;  %vm406_vm10 = vweird.f32 %v2181_v30  ;;  %v458_v35 = vsel %vm457_vm1, %v2701_v54, %v454_v19 }
  0xd8   : > { %2184 = vrsqrt.f32 %v2756_v53  ;;  %v390_v4 = vmul.f32 %v2183_v62, %v2729_v25  ;;  %v360_v7 = vsub.f32 %v344_v55, %v352_v49  ;;  %vm396_vm15 = vweird.f32 %v2183_v62  ;;  %vm2780_vm0 = vmor %vm405_vm9, %vm406_vm10 }
  0xd9   : > { %v401_v59 = vmul.f32 %v2181_v30, %v400_v63  ;;  %v468_v23 = vsel %vm2775_vm13, %v2708_v8, %v464_v9  ;;  %v373_v8 = vsub.f32 %v2619_v10, %v2679_v17  ;;  %vm397_vm2 = vmor %vm395_vm14, %vm396_vm15  ;;  %v475_v40 = vmul.f32 %v458_v35, %v379_v36 }
  0xda   : > { %v391_v13 = vmul.f32 %v2183_v62, %v390_v4  ;;  %v368_v14 = vmax.f32 %v360_v7, 0.0  ;;  %v476_v41 = vmul.f32 %v468_v23, %v380_v28  ;;  %vm415_vm5 = vweird.f32 %v2756_v53 }
  0xdb   : > { %v402_v15 = vmul.f32 0.5, %v401_v59 }
  0xdc   : > { %v392_v21 = vmul.f32 0.5, %v391_v13  ;;  %v384_v22 = vadd.f32 1e-07, %v368_v14  ;;  %v480_v3 = vpack.c.bf16 %v476_v41, %v475_v40 }
  0xdd   : > { %v403_v1 = vsub.f32 1.5, %v402_v15 }
  0xde   : > { %v2185_v24 = vpop.eup %2184  ;;  %v393_v33 = vsub.f32 1.5, %v392_v21  ;;  %2186 = vrsqrt.f32 %v384_v22  ;;  %vm425_vm3 = vweird.f32 %v384_v22 }
  0xdf   : > { %v410_v26 = vmul.f32 %v2185_v24, %v2756_v53  ;;  %v404_v27 = vmul.f32 %v2181_v30, %v403_v1  ;;  %vm416_vm6 = vweird.f32 %v2185_v24 }
  0xe0   : > { %v394_v58 = vmul.f32 %v2183_v62, %v393_v33  ;;  %vm417_vm8 = vmor %vm415_vm5, %vm416_vm6 }
  0xe1   : > { %v411_v34 = vmul.f32 %v2185_v24, %v410_v26  ;;  %v408_v6 = vsel %vm2780_vm0, %v2181_v30, %v404_v27 }
  0xe2   : > { %v398_v39 = vsel %vm397_vm2, %v2183_v62, %v394_v58  ;;  %v470_v12 = vmul.f32 %v408_v6, %v374_v31 }
  0xe3   : > { %v469_v32 = vmul.f32 %v398_v39, %v373_v8  ;;  %v412_v54 = vmul.f32 0.5, %v411_v34 }
  0xe4   : > { %v2187_v42 = vpop.eup %2186 }
  0xe5   : > { %v420_v43 = vmul.f32 %v2187_v42, %v384_v22  ;;  %v477_v44 = vpack.c.bf16 %v470_v12, %v469_v32  ;;  %v413_v10 = vsub.f32 1.5, %v412_v54  ;;  %vm426_vm4 = vweird.f32 %v2187_v42 }
  0xe6   : > { %600 = vmatmul.bf16.gmra.mxu2 %v480_v3  ;;  %629 = vmatmul.bf16.gmra.mxu3 %v480_v3  ;;  %vm427_vm7 = vmor %vm425_vm3, %vm426_vm4 }
  0xe7   : > { %v421_v37 = vmul.f32 %v2187_v42, %v420_v43  ;;  %585 = vmatmul.bf16.vlgmr.msra.gmra.mxu0 %v477_v44  ;;  %614 = vmatmul.bf16.vlgmr.msra.gmra.mxu1 %v477_v44  ;;  %v414_v45 = vmul.f32 %v2185_v24, %v413_v10 }
  0xe9   : > { %v422_v17 = vmul.f32 0.5, %v421_v37  ;;  %v418_v48 = vsel %vm417_vm8, %v2185_v24, %v414_v45 }
  0xea   : > { %v471_v49 = vmul.f32 %v418_v48, %v375_v5 }
  0xeb   : > { %v423_v25 = vsub.f32 1.5, %v422_v17 }
  0xed   : > { %v424_v57 = vmul.f32 %v2187_v42, %v423_v25 }
  0xef   : > { %v428_v47 = vsel %vm427_vm7, %v2187_v42, %v424_v57 }
  0xf0   : > { %v472_v29 = vmul.f32 %v428_v47, %v376_v46 }
  0xf2   : > { %v478_v50 = vpack.c.bf16 %v472_v29, %v471_v49 }
  0xf6   : > { %739 = vmatmul.bf16.vlgmr.msrb.gmra.mxu2 %v477_v44  ;;  %768 = vmatmul.bf16.vlgmr.msrb.gmra.mxu3 %v477_v44 }
  0xf7   : > { %590 = vmatmul.bf16.gmra.mxu0 %v478_v50  ;;  %619 = vmatmul.bf16.gmra.mxu1 %v478_v50 }
 0x106   : > { %744 = vmatmul.bf16.gmra.mxu2 %v478_v50  ;;  %773 = vmatmul.bf16.gmra.mxu3 %v478_v50 }
 0x116   : > { %749 = vmatmul.bf16.gmra.mxu2 %v2759_v56  ;;  %778 = vmatmul.bf16.gmra.mxu3 %v2759_v56 }
 0x126   : > { %754 = vmatmul.bf16.gmra.mxu2 %v480_v3  ;;  %783 = vmatmul.bf16.gmra.mxu3 %v480_v3 }
 0x159   : > { %v596_v18 = vpop.f32.mrf.mxu2  ;;  %v625_v38 = vpop.f32.mrf.mxu3 }
 0x15a   : > { %v2811_v51 = vpack.c.bf16 %v625_v38, %v596_v18 }
 0x161   : > { %v598_v16 = vpop.f32.mrf.mxu2  ;;  %v627_v11 = vpop.f32.mrf.mxu3 }
 0x162   : > { %v2813_v52 = vpack.c.bf16 %v627_v11, %v598_v16 }
 0x164   : > { %v586_v55 = vpop.f32.mrf.mxu0  ;;  %v615_v60 = vpop.f32.mrf.mxu1 }
 0x165   : > { %v2825_v23 = vpack.c.bf16 %v615_v60, %v586_v55 }
 0x167   : > { %v1165_v12 = vunpack.c.l.bf16 %v2825_v23  ;;  %v1166_v32 = vunpack.c.h.bf16 %v2825_v23 }
 0x169   : > { %v601_v53 = vpop.f32.mrf.mxu2  ;;  %v630_v30 = vpop.f32.mrf.mxu3 }
 0x16a   : > { %v2815_v61 = vpack.c.bf16 %v630_v30, %v601_v53 }
 0x16c   : > { %v588_v56 = vpop.f32.mrf.mxu0  ;;  %v617_v4 = vpop.f32.mrf.mxu1 }
 0x16d   : > { %v2835_v36 = vpack.c.bf16 %v617_v4, %v588_v56 }
 0x16f   : > { %v1167_v25 = vunpack.c.l.bf16 %v2835_v36  ;;  %v1168_v48 = vunpack.c.h.bf16 %v2835_v36 }
 0x171   : > { %v603_v62 = vpop.f32.mrf.mxu2  ;;  %v632_v63 = vpop.f32.mrf.mxu3 }
 0x172   : > { %v2817_v0 = vpack.c.bf16 %v632_v63, %v603_v62 }
 0x174   : > { %v591_v15 = vpop.f32.mrf.mxu0  ;;  %v620_v19 = vpop.f32.mrf.mxu1 }
 0x175   : > { %v2842_v40 = vpack.c.bf16 %v620_v19, %v591_v15 }
 0x177   : > { %v1169_v50 = vunpack.c.l.bf16 %v2842_v40  ;;  %v1170_v60 = vunpack.c.h.bf16 %v2842_v40 }
 0x179   : > { %v740_v7 = vpop.f32.mrf.mxu2  ;;  %v769_v59 = vpop.f32.mrf.mxu3 }
 0x17a   : > { %v797_v9 = vpack.c.bf16 %v769_v59, %v740_v7 }
 0x17c   : > { %v2819_v13 = vunpack.c.l.bf16 %v797_v9  ;;  %v2821_v14 = vunpack.c.h.bf16 %v797_v9  ;;  %v593_v42 = vpop.f32.mrf.mxu0  ;;  %v622_v10 = vpop.f32.mrf.mxu1 }
 0x17d   : > { %v2854_v18 = vpack.c.bf16 %v622_v10, %v593_v42 }
 0x17e   : > { %v845_v21 = vmul.f32 0.044677734, %v2819_v13  ;;  %v846_v22 = vmul.f32 0.044677734, %v2821_v14  ;;  %v821_v43 = vmul.f32 0.5, %v2819_v13  ;;  %v822_v44 = vmul.f32 0.5, %v2821_v14 }
 0x180   : > { %v861_v24 = vpack.c.bf16 %v846_v22, %v845_v21  ;;  %v2856_v11 = vpack.c.bf16 %v822_v44, %v821_v43 }
 0x181   : > { %v742_v2 = vpop.f32.mrf.mxu2  ;;  %v771_v1 = vpop.f32.mrf.mxu3 }
 0x182   : > { %v869_v20 = vunpack.c.l.bf16 %v861_v24  ;;  %v870_v33 = vunpack.c.h.bf16 %v861_v24  ;;  %v798_v26 = vpack.c.bf16 %v771_v1, %v742_v2 }
 0x184   : > { %v885_v28 = vmul.f32 %v869_v20, %v2819_v13  ;;  %v886_v27 = vmul.f32 %v870_v33, %v2821_v14  ;;  %v2829_v31 = vunpack.c.l.bf16 %v798_v26  ;;  %v2831_v58 = vunpack.c.h.bf16 %v798_v26 }
 0x185   : > { %v1109_v33 = vunpack.c.l.bf16 %v2856_v11 }
 0x186   : > { %v901_v41 = vpack.c.bf16 %v886_v27, %v885_v28  ;;  %v847_v39 = vmul.f32 0.044677734, %v2829_v31  ;;  %v848_v54 = vmul.f32 0.044677734, %v2831_v58  ;;  %v823_v45 = vmul.f32 0.5, %v2829_v31 }
 0x187   : > { %v824_v57 = vmul.f32 0.5, %v2831_v58 }
 0x188   : > { %v909_v3 = vunpack.c.l.bf16 %v901_v41  ;;  %v910_v37 = vunpack.c.h.bf16 %v901_v41  ;;  %v862_v46 = vpack.c.bf16 %v848_v54, %v847_v39  ;;  %v1110_v39 = vunpack.c.h.bf16 %v2856_v11 }
 0x189   : > { %v745_v17 = vpop.f32.mrf.mxu2  ;;  %v774_v47 = vpop.f32.mrf.mxu3  ;;  %v2863_v62 = vpack.c.bf16 %v824_v57, %v823_v45 }
 0x18a   : > { %v925_v5 = vmul.f32 %v909_v3, %v2819_v13  ;;  %v926_v29 = vmul.f32 %v910_v37, %v2821_v14  ;;  %v799_v49 = vpack.c.bf16 %v774_v47, %v745_v17  ;;  %v871_v38 = vunpack.c.l.bf16 %v862_v46 }
 0x18b   : > { %v872_v16 = vunpack.c.h.bf16 %v862_v46  ;;  %v1111_v44 = vunpack.c.l.bf16 %v2863_v62 }
 0x18c   : > { %v941_v53 = vpack.c.bf16 %v926_v29, %v925_v5  ;;  %v2858_v55 = vunpack.c.l.bf16 %v799_v49  ;;  %v2860_v30 = vunpack.c.h.bf16 %v799_v49  ;;  %v887_v63 = vmul.f32 %v871_v38, %v2829_v31 }
 0x18d   : > { %v888_v56 = vmul.f32 %v872_v16, %v2831_v58  ;;  %v1112_v29 = vunpack.c.h.bf16 %v2863_v62 }
 0x18e   : > { %v949_v4 = vunpack.c.l.bf16 %v941_v53  ;;  %v950_v7 = vunpack.c.h.bf16 %v941_v53  ;;  %v825_v59 = vmul.f32 0.5, %v2858_v55  ;;  %v826_v9 = vmul.f32 0.5, %v2860_v30 }
 0x18f   : > { %v902_v19 = vpack.c.bf16 %v888_v56, %v887_v63  ;;  %v849_v21 = vmul.f32 0.044677734, %v2858_v55  ;;  %v850_v22 = vmul.f32 0.044677734, %v2860_v30 }
 0x190   : > { %v965_v24 = vadd.f32 %v949_v4, %v2819_v13  ;;  %v966_v2 = vadd.f32 %v950_v7, %v2821_v14  ;;  %v2877_v54 = vpack.c.bf16 %v826_v9, %v825_v59 }
 0x191   : > { %v747_v20 = vpop.f32.mrf.mxu2  ;;  %v911_v26 = vunpack.c.l.bf16 %v902_v19  ;;  %v912_v28 = vunpack.c.h.bf16 %v902_v19  ;;  %v863_v27 = vpack.c.bf16 %v850_v22, %v849_v21  ;;  %v776_v41 = vpop.f32.mrf.mxu3 }
 0x192   : > { %v981_v42 = vpack.c.bf16 %v966_v2, %v965_v24  ;;  %v800_v43 = vpack.c.bf16 %v776_v41, %v747_v20  ;;  %v1113_v21 = vunpack.c.l.bf16 %v2877_v54  ;;  %v1114_v22 = vunpack.c.h.bf16 %v2877_v54 }
 0x193   : > { %v927_v13 = vmul.f32 %v911_v26, %v2829_v31  ;;  %v928_v14 = vmul.f32 %v912_v28, %v2831_v58  ;;  %v873_v3 = vunpack.c.l.bf16 %v863_v27  ;;  %v874_v37 = vunpack.c.h.bf16 %v863_v27 }
 0x194   : > { %v989_v10 = vunpack.c.l.bf16 %v981_v42  ;;  %v990_v17 = vunpack.c.h.bf16 %v981_v42  ;;  %v2882_v45 = vunpack.c.l.bf16 %v800_v43  ;;  %v2884_v57 = vunpack.c.h.bf16 %v800_v43 }
 0x195   : > { %v942_v46 = vpack.c.bf16 %v928_v14, %v927_v13  ;;  %v889_v47 = vmul.f32 %v873_v3, %v2858_v55  ;;  %v890_v5 = vmul.f32 %v874_v37, %v2860_v30 }
 0x196   : > { %v1005_v49 = vmul.f32 0.796875, %v989_v10  ;;  %v1006_v38 = vmul.f32 0.796875, %v990_v17  ;;  %v827_v16 = vmul.f32 0.5, %v2882_v45  ;;  %v828_v53 = vmul.f32 0.5, %v2884_v57 }
 0x197   : > { %v951_v63 = vunpack.c.l.bf16 %v942_v46  ;;  %v952_v56 = vunpack.c.h.bf16 %v942_v46  ;;  %v903_v4 = vpack.c.bf16 %v890_v5, %v889_v47  ;;  %v851_v7 = vmul.f32 0.044677734, %v2882_v45 }
 0x198   : > { %v1021_v59 = vpack.c.bf16 %v1006_v38, %v1005_v49  ;;  %v852_v9 = vmul.f32 0.044677734, %v2884_v57  ;;  %v2899_v37 = vpack.c.bf16 %v828_v53, %v827_v16 }
 0x199   : > { %v750_v19 = vpop.f32.mrf.mxu2  ;;  %v967_v24 = vadd.f32 %v951_v63, %v2829_v31  ;;  %v968_v2 = vadd.f32 %v952_v56, %v2831_v58  ;;  %v913_v20 = vunpack.c.l.bf16 %v903_v4  ;;  %v914_v26 = vunpack.c.h.bf16 %v903_v4  ;;  %v779_v28 = vpop.f32.mrf.mxu3 }
 0x19a   : > { %v1029_v27 = vunpack.c.l.bf16 %v1021_v59  ;;  %v1030_v41 = vunpack.c.h.bf16 %v1021_v59  ;;  %v864_v42 = vpack.c.bf16 %v852_v9, %v851_v7  ;;  %v801_v43 = vpack.c.bf16 %v779_v28, %v750_v19 }
 0x19b   : > { %v982_v13 = vpack.c.bf16 %v968_v2, %v967_v24  ;;  %v929_v14 = vmul.f32 %v913_v20, %v2858_v55  ;;  %v930_v3 = vmul.f32 %v914_v26, %v2860_v30 }
 0x19c   : > { %2188 = vtanh.f32 %v1029_v27  ;;  %v875_v10 = vunpack.c.l.bf16 %v864_v42  ;;  %v876_v17 = vunpack.c.h.bf16 %v864_v42  ;;  %v2901_v31 = vunpack.c.l.bf16 %v801_v43 }
 0x19d   : > { %2190 = vtanh.f32 %v1030_v41  ;;  %v991_v58 = vunpack.c.l.bf16 %v982_v13  ;;  %v992_v46 = vunpack.c.h.bf16 %v982_v13  ;;  %v943_v47 = vpack.c.bf16 %v930_v3, %v929_v14 }
 0x19e   : > { %v891_v5 = vmul.f32 %v875_v10, %v2882_v45  ;;  %v892_v49 = vmul.f32 %v876_v17, %v2884_v57  ;;  %v2905_v38 = vunpack.c.h.bf16 %v801_v43  ;;  %v829_v63 = vmul.f32 0.5, %v2901_v31 }
 0x19f   : > { %v1007_v56 = vmul.f32 0.796875, %v991_v58  ;;  %v1008_v16 = vmul.f32 0.796875, %v992_v46  ;;  %v953_v53 = vunpack.c.l.bf16 %v943_v47  ;;  %v954_v4 = vunpack.c.h.bf16 %v943_v47 }
 0x1a0   : > { %v904_v7 = vpack.c.bf16 %v892_v49, %v891_v5  ;;  %v830_v59 = vmul.f32 0.5, %v2905_v38  ;;  %v853_v9 = vmul.f32 0.044677734, %v2901_v31  ;;  %v854_v19 = vmul.f32 0.044677734, %v2905_v38 }
 0x1a1   : > { %v752_v24 = vpop.f32.mrf.mxu2  ;;  %v1022_v2 = vpack.c.bf16 %v1008_v16, %v1007_v56  ;;  %v969_v20 = vadd.f32 %v953_v53, %v2858_v55  ;;  %v970_v26 = vadd.f32 %v954_v4, %v2860_v30  ;;  %v781_v28 = vpop.f32.mrf.mxu3 }
 0x1a2   : > { %v2189_v41 = vpop.eup %2188  ;;  %v915_v42 = vunpack.c.l.bf16 %v904_v7  ;;  %v916_v43 = vunpack.c.h.bf16 %v904_v7  ;;  %v865_v13 = vpack.c.bf16 %v854_v19, %v853_v9  ;;  %v2915_v58 = vpack.c.bf16 %v830_v59, %v829_v63 }
 0x1a3   : > { %v2191_v3 = vpop.eup %2190  ;;  %v1031_v10 = vunpack.c.l.bf16 %v1022_v2  ;;  %v983_v17 = vpack.c.bf16 %v970_v26, %v969_v20  ;;  %v802_v46 = vpack.c.bf16 %v781_v28, %v752_v24  ;;  %v1032_v49 = vunpack.c.h.bf16 %v1022_v2 }
 0x1a4   : > { %v931_v47 = vmul.f32 %v915_v42, %v2882_v45  ;;  %v932_v55 = vmul.f32 %v916_v43, %v2884_v57  ;;  %v877_v30 = vunpack.c.l.bf16 %v865_v13  ;;  %v878_v5 = vunpack.c.h.bf16 %v865_v13 }
 0x1a5   : > { %v993_v56 = vunpack.c.l.bf16 %v983_v17  ;;  %v994_v16 = vunpack.c.h.bf16 %v983_v17  ;;  %v2919_v53 = vunpack.c.l.bf16 %v802_v46  ;;  %2192 = vtanh.f32 %v1031_v10 }
 0x1a6   : > { %v944_v4 = vpack.c.bf16 %v932_v55, %v931_v47  ;;  %v893_v7 = vmul.f32 %v877_v30, %v2901_v31  ;;  %v894_v9 = vmul.f32 %v878_v5, %v2905_v38  ;;  %v2923_v19 = vunpack.c.h.bf16 %v802_v46 }
 0x1a7   : > { %v1009_v63 = vmul.f32 0.796875, %v993_v56  ;;  %v1010_v59 = vmul.f32 0.796875, %v994_v16  ;;  %v831_v24 = vmul.f32 0.5, %v2919_v53  ;;  %v855_v2 = vmul.f32 0.044677734, %v2919_v53 }
 0x1a8   : > { %v955_v20 = vunpack.c.l.bf16 %v944_v4  ;;  %v956_v26 = vunpack.c.h.bf16 %v944_v4  ;;  %v905_v28 = vpack.c.bf16 %v894_v9, %v893_v7  ;;  %v832_v13 = vmul.f32 0.5, %v2923_v19 }
 0x1a9   : > { %v755_v42 = vpop.f32.mrf.mxu2  ;;  %v1023_v43 = vpack.c.bf16 %v1010_v59, %v1009_v63  ;;  %v856_v10 = vmul.f32 0.044677734, %v2923_v19  ;;  %v784_v17 = vpop.f32.mrf.mxu3  ;;  %v2929_v47 = vpack.c.bf16 %v2191_v3, %v2189_v41  ;;  %2194 = vtanh.f32 %v1032_v49 }
 0x1aa   : > { %v971_v55 = vadd.f32 %v955_v20, %v2882_v45  ;;  %v972_v46 = vadd.f32 %v956_v26, %v2884_v57  ;;  %v917_v30 = vunpack.c.l.bf16 %v905_v28  ;;  %v918_v5 = vunpack.c.h.bf16 %v905_v28 }
 0x1ab   : > { %v1033_v56 = vunpack.c.l.bf16 %v1023_v43  ;;  %v1034_v16 = vunpack.c.h.bf16 %v1023_v43  ;;  %v866_v4 = vpack.c.bf16 %v856_v10, %v855_v2  ;;  %v2933_v7 = vpop.eup %2192  ;;  %v803_v6 = vpack.c.bf16 %v784_v17, %v755_v42 }
 0x1ac   : > { %v984_v9 = vpack.c.bf16 %v972_v46, %v971_v55  ;;  %v933_v63 = vmul.f32 %v917_v30, %v2901_v31  ;;  %v934_v59 = vmul.f32 %v918_v5, %v2905_v38  ;;  %v2937_v41 = vpack.c.bf16 %v832_v13, %v831_v24 }
 0x1ad   : > { %2196 = vtanh.f32 %v1033_v56  ;;  %v879_v45 = vunpack.c.l.bf16 %v866_v4  ;;  %v880_v3 = vunpack.c.h.bf16 %v866_v4  ;;  %v1069_v49 = vunpack.c.l.bf16 %v2929_v47 }
 0x1ae   : > { %v995_v57 = vunpack.c.l.bf16 %v984_v9  ;;  %v996_v20 = vunpack.c.h.bf16 %v984_v9  ;;  %v945_v26 = vpack.c.bf16 %v934_v59, %v933_v63  ;;  %v2942_v43 = vunpack.c.l.bf16 %v803_v6 }
 0x1af   : > { %v895_v28 = vmul.f32 %v879_v45, %v2919_v53  ;;  %v896_v2 = vmul.f32 %v880_v3, %v2923_v19  ;;  %v2944_v10 = vunpack.c.h.bf16 %v803_v6  ;;  %v2195_v46 = vpop.eup %2194  ;;  %2198 = vtanh.f32 %v1034_v16 }
 0x1b0   : > { %v1011_v55 = vmul.f32 0.796875, %v995_v57  ;;  %v1012_v42 = vmul.f32 0.796875, %v996_v20  ;;  %v957_v17 = vunpack.c.l.bf16 %v945_v26  ;;  %v958_v24 = vunpack.c.h.bf16 %v945_v26 }
 0x1b1   : > { %v757_v13 = vpop.f32.mrf.mxu2  ;;  %v906_v30 = vpack.c.bf16 %v896_v2, %v895_v28  ;;  %v833_v5 = vmul.f32 0.5, %v2942_v43  ;;  %v834_v56 = vmul.f32 0.5, %v2944_v10  ;;  %v857_v4 = vmul.f32 0.044677734, %v2942_v43  ;;  %v786_v9 = vpop.f32.mrf.mxu3 }
 0x1b2   : > { %v1024_v63 = vpack.c.bf16 %v1012_v42, %v1011_v55  ;;  %v973_v59 = vadd.f32 %v957_v17, %v2901_v31  ;;  %v974_v6 = vadd.f32 %v958_v24, %v2905_v38  ;;  %v858_v45 = vmul.f32 0.044677734, %v2944_v10 }
 0x1b3   : > { %v2952_v3 = vpop.eup %2196  ;;  %v919_v57 = vunpack.c.l.bf16 %v906_v30  ;;  %v920_v20 = vunpack.c.h.bf16 %v906_v30  ;;  %v804_v26 = vpack.c.bf16 %v786_v9, %v757_v13  ;;  %v2954_v8 = vpack.c.bf16 %v834_v56, %v833_v5 }
 0x1b4   : > { %v1035_v28 = vunpack.c.l.bf16 %v1024_v63  ;;  %v985_v2 = vpack.c.bf16 %v974_v6, %v973_v59  ;;  %v867_v35 = vpack.c.bf16 %v858_v45, %v857_v4  ;;  %v1036_v42 = vunpack.c.h.bf16 %v1024_v63 }
 0x1b5   : > { %v935_v34 = vmul.f32 %v919_v57, %v2919_v53  ;;  %v936_v55 = vmul.f32 %v920_v20, %v2923_v19  ;;  %v2958_v31 = vunpack.c.l.bf16 %v804_v26  ;;  %v2960_v38 = vunpack.c.h.bf16 %v804_v26  ;;  %v2199_v6 = vpop.eup %2198 }
 0x1b6   : > { %v997_v17 = vunpack.c.l.bf16 %v985_v2  ;;  %v998_v24 = vunpack.c.h.bf16 %v985_v2  ;;  %v881_v16 = vunpack.c.l.bf16 %v867_v35  ;;  %2200 = vtanh.f32 %v1035_v28 }
 0x1b7   : > { %v946_v30 = vpack.c.bf16 %v936_v55, %v935_v34  ;;  %v882_v13 = vunpack.c.h.bf16 %v867_v35  ;;  %v835_v9 = vmul.f32 0.5, %v2958_v31  ;;  %v836_v59 = vmul.f32 0.5, %v2960_v38 }
 0x1b8   : > { %v1013_v5 = vmul.f32 0.796875, %v997_v17  ;;  %v1014_v56 = vmul.f32 0.796875, %v998_v24  ;;  %v897_v4 = vmul.f32 %v881_v16, %v2942_v43  ;;  %v859_v63 = vmul.f32 0.044677734, %v2958_v31 }
 0x1b9   : > { %v959_v45 = vunpack.c.l.bf16 %v946_v30  ;;  %v960_v57 = vunpack.c.h.bf16 %v946_v30  ;;  %v898_v20 = vmul.f32 %v882_v13, %v2944_v10  ;;  %2202 = vtanh.f32 %v1036_v42 }
 0x1ba   : > { %v1025_v26 = vpack.c.bf16 %v1014_v56, %v1013_v5  ;;  %v860_v34 = vmul.f32 0.044677734, %v2960_v38  ;;  %v1070_v35 = vunpack.c.h.bf16 %v2929_v47  ;;  %v1085_v17 = vadd.f32 1.0, %v1069_v49 }
 0x1bb   : > { %v975_v28 = vadd.f32 %v959_v45, %v2919_v53  ;;  %v976_v2 = vadd.f32 %v960_v57, %v2923_v19  ;;  %v907_v55 = vpack.c.bf16 %v898_v20, %v897_v4  ;;  %v2971_v16 = vpack.c.bf16 %v836_v59, %v835_v9 }
 0x1bc   : > { %v1037_v24 = vunpack.c.l.bf16 %v1025_v26  ;;  %v868_v30 = vpack.c.bf16 %v860_v34, %v859_v63  ;;  %v1086_v1 = vadd.f32 1.0, %v1070_v35  ;;  %v2973_v13 = vpop.eup %2200  ;;  %v1062_v56 = vpack.c.bf16 %v2195_v46, %v2933_v7 }
 0x1bd   : > { %v986_v15 = vpack.c.bf16 %v976_v2, %v975_v28  ;;  %v921_v42 = vunpack.c.l.bf16 %v907_v55  ;;  %v922_v5 = vunpack.c.h.bf16 %v907_v55  ;;  %v1038_v14 = vunpack.c.h.bf16 %v1025_v26 }
 0x1be   : > { %v883_v47 = vunpack.c.l.bf16 %v868_v30  ;;  %v884_v27 = vunpack.c.h.bf16 %v868_v30  ;;  %v1101_v53 = vpack.c.bf16 %v1086_v1, %v1085_v17  ;;  %2204 = vtanh.f32 %v1037_v24 }
 0x1bf   : > { %v999_v19 = vunpack.c.l.bf16 %v986_v15  ;;  %v1000_v4 = vunpack.c.h.bf16 %v986_v15  ;;  %v937_v49 = vmul.f32 %v921_v42, %v2942_v43  ;;  %v2977_v9 = vpop.eup %2202  ;;  %v938_v59 = vmul.f32 %v922_v5, %v2944_v10 }
 0x1c0   : > { %v899_v45 = vmul.f32 %v883_v47, %v2958_v31  ;;  %v900_v57 = vmul.f32 %v884_v27, %v2960_v38  ;;  %v1125_v20 = vunpack.c.l.bf16 %v1101_v53  ;;  %v1126_v46 = vunpack.c.h.bf16 %v1101_v53 }
 0x1c1   : > { %v1015_v63 = vmul.f32 0.796875, %v999_v19  ;;  %v1016_v7 = vmul.f32 0.796875, %v1000_v4  ;;  %v1071_v26 = vunpack.c.l.bf16 %v1062_v56  ;;  %v947_v34 = vpack.c.bf16 %v938_v59, %v937_v49 }
 0x1c2   : > { %v908_v1 = vpack.c.bf16 %v900_v57, %v899_v45  ;;  %v1141_v15 = vmul.f32 %v1125_v20, %v1109_v33  ;;  %v1072_v35 = vunpack.c.h.bf16 %v1062_v56  ;;  %v1142_v2 = vmul.f32 %v1126_v46, %v1110_v39 }
 0x1c3   : > { %v2984_v28 = vpack.c.bf16 %v1016_v7, %v1015_v63  ;;  %v1087_v55 = vadd.f32 1.0, %v1071_v26  ;;  %v1063_v17 = vpack.c.bf16 %v2199_v6, %v2952_v3  ;;  %v961_v27 = vunpack.c.l.bf16 %v947_v34 }
 0x1c4   : > { %v962_v24 = vunpack.c.h.bf16 %v947_v34  ;;  %v923_v30 = vunpack.c.l.bf16 %v908_v1  ;;  %v924_v42 = vunpack.c.h.bf16 %v908_v1  ;;  %v2989_v5 = vpop.eup %2204  ;;  %2206 = vtanh.f32 %v1038_v14 }
 0x1c5   : > { %v1039_v47 = vunpack.c.l.bf16 %v2984_v28  ;;  %v1157_v53 = vpack.c.bf16 %v1142_v2, %v1141_v15  ;;  %v1088_v33 = vadd.f32 1.0, %v1072_v35  ;;  %v977_v56 = vadd.f32 %v961_v27, %v2942_v43 }
 0x1c6   : > { %v978_v19 = vadd.f32 %v962_v24, %v2944_v10  ;;  %v939_v11 = vmul.f32 %v923_v30, %v2958_v31  ;;  %v940_v39 = vmul.f32 %v924_v42, %v2960_v38  ;;  %v1040_v3 = vunpack.c.h.bf16 %v2984_v28 }
 0x1c7   : > { %v1181_v6 = vunpack.c.l.bf16 %v1157_v53  ;;  %v1182_v4 = vunpack.c.h.bf16 %v1157_v53  ;;  %v1102_v49 = vpack.c.bf16 %v1088_v33, %v1087_v55  ;;  %2208 = vtanh.f32 %v1039_v47 }
 0x1c8   : > { %v987_v59 = vpack.c.bf16 %v978_v19, %v977_v56  ;;  %v948_v14 = vpack.c.bf16 %v940_v39, %v939_v11  ;;  %v1073_v45 = vunpack.c.l.bf16 %v1063_v17  ;;  %v1074_v28 = vunpack.c.h.bf16 %v1063_v17 }
 0x1c9   : > { %v1197_v57 = vmul.f32 %v1181_v6, %v1165_v12  ;;  %v1198_v43 = vmul.f32 %v1182_v4, %v1166_v32  ;;  %v1127_v10 = vunpack.c.l.bf16 %v1102_v49  ;;  %v1128_v20 = vunpack.c.h.bf16 %v1102_v49 }
 0x1ca   : > { %v1001_v63 = vunpack.c.l.bf16 %v987_v59  ;;  %v1002_v7 = vunpack.c.h.bf16 %v987_v59  ;;  %v963_v46 = vunpack.c.l.bf16 %v948_v14  ;;  %v964_v26 = vunpack.c.h.bf16 %v948_v14  ;;  %v2207_v34 = vpop.eup %2206 }
 0x1cb   : > { %v1213_v1 = vpack.c.bf16 %v1198_v43, %v1197_v57  ;;  %v1143_v15 = vmul.f32 %v1127_v10, %v1111_v44  ;;  %v1144_v35 = vmul.f32 %v1128_v20, %v1112_v29  ;;  %v1089_v30 = vadd.f32 1.0, %v1073_v45 }
 0x1cc   : > { %v1017_v2 = vmul.f32 0.796875, %v1001_v63  ;;  %v1018_v12 = vmul.f32 0.796875, %v1002_v7  ;;  %v979_v23 = vadd.f32 %v963_v46, %v2958_v31  ;;  %v980_v32 = vadd.f32 %v964_v26, %v2960_v38 }
 0x1cd   : > { %v3007_v55 = vunpack.c.l.bf16 %v1213_v1  ;;  %v3009_v27 = vunpack.c.h.bf16 %v1213_v1  ;;  %v1158_v24 = vpack.c.bf16 %v1144_v35, %v1143_v15  ;;  %v2209_v42 = vpop.eup %2208  ;;  %v1090_v44 = vadd.f32 1.0, %v1074_v28 }
 0x1ce   : > { %v1027_v47 = vpack.c.bf16 %v1018_v12, %v1017_v2  ;;  %v988_v53 = vpack.c.bf16 %v980_v32, %v979_v23  ;;  %v1064_v62 = vpack.c.bf16 %v2977_v9, %v2973_v13  ;;  %2210 = vtanh.f32 %v1040_v3 }
 0x1cf   : > { %v1237_v29 = vadd.f32 %v3009_v27, %v3007_v55  ;;  %v1276_v31 = vmul.f32 %v3007_v55, %v3007_v55  ;;  %v1277_v38 = vmul.f32 %v3009_v27, %v3009_v27  ;;  %v1183_v17 = vunpack.c.l.bf16 %v1158_v24 }
 0x1d0   : > { %v1041_v33 = vunpack.c.l.bf16 %v1027_v47  ;;  %v1042_v56 = vunpack.c.h.bf16 %v1027_v47  ;;  %v1003_v19 = vunpack.c.l.bf16 %v988_v53  ;;  %v1004_v11 = vunpack.c.h.bf16 %v988_v53 }
 0x1d1   : > { %1238 = vadd.xlane.f32.xlu1 %v1237_v29  ;;  %v1292_v39 = vadd.f32 %v1277_v38, %v1276_v31  ;;  %v1184_v6 = vunpack.c.h.bf16 %v1158_v24  ;;  %v1199_v13 = vmul.f32 %v1183_v17, %v1167_v25  ;;  %v1103_v9 = vpack.c.bf16 %v1090_v44, %v1089_v30 }
 0x1d2   : > { %v1019_v4 = vmul.f32 0.796875, %v1003_v19  ;;  %v1020_v49 = vmul.f32 0.796875, %v1004_v11  ;;  %v1075_v59 = vunpack.c.l.bf16 %v1064_v62  ;;  %2212 = vtanh.f32 %v1041_v33 }
 0x1d3   : > { %1293 = vadd.xlane.f32.xlu0 %v1292_v39  ;;  %v1200_v14 = vmul.f32 %v1184_v6, %v1168_v48  ;;  %v1129_v45 = vunpack.c.l.bf16 %v1103_v9  ;;  %v1130_v57 = vunpack.c.h.bf16 %v1103_v9  ;;  %v1076_v10 = vunpack.c.h.bf16 %v1064_v62 }
 0x1d4   : > { %v1028_v43 = vpack.c.bf16 %v1020_v49, %v1019_v4  ;;  %v1091_v20 = vadd.f32 1.0, %v1075_v59  ;;  %v1065_v63 = vpack.c.bf16 %v2207_v34, %v2989_v5  ;;  %2214 = vtanh.f32 %v1042_v56  ;;  %v2211_v2 = vpop.eup %2210 }
 0x1d5   : > { %v1214_v7 = vpack.c.bf16 %v1200_v14, %v1199_v13  ;;  %v1145_v25 = vmul.f32 %v1129_v45, %v1113_v21  ;;  %v1146_v3 = vmul.f32 %v1130_v57, %v1114_v22  ;;  %v1092_v1 = vadd.f32 1.0, %v1076_v10 }
 0x1d6   : > { %v1043_v46 = vunpack.c.l.bf16 %v1028_v43  ;;  %v1044_v26 = vunpack.c.h.bf16 %v1028_v43  ;;  %v1077_v36 = vunpack.c.l.bf16 %v1065_v63  ;;  %v1078_v28 = vunpack.c.h.bf16 %v1065_v63 }
 0x1d7   : > { %v3028_v48 = vunpack.c.l.bf16 %v1214_v7  ;;  %v3030_v15 = vunpack.c.h.bf16 %v1214_v7  ;;  %v1159_v35 = vpack.c.bf16 %v1146_v3, %v1145_v25  ;;  %v1104_v5 = vpack.c.bf16 %v1092_v1, %v1091_v20 }
 0x1d8   : > { %2216 = vtanh.f32 %v1043_v46  ;;  %v1093_v34 = vadd.f32 1.0, %v1077_v36  ;;  %v1117_v12 = vunpack.c.l.bf16 %v2915_v58  ;;  %v2213_v21 = vpop.eup %2212  ;;  %v1118_v32 = vunpack.c.h.bf16 %v2915_v58 }
 0x1d9   : > { %v1240_v54 = vadd.f32 %v3030_v15, %v3028_v48  ;;  %v1278_v22 = vmul.f32 %v3028_v48, %v3028_v48  ;;  %v1279_v23 = vmul.f32 %v3030_v15, %v3030_v15  ;;  %v1185_v24 = vunpack.c.l.bf16 %v1159_v35 }
 0x1da   : > { %v1186_v30 = vunpack.c.h.bf16 %v1159_v35  ;;  %v1131_v47 = vunpack.c.l.bf16 %v1104_v5  ;;  %v1132_v53 = vunpack.c.h.bf16 %v1104_v5  ;;  %v2215_v44 = vpop.eup %2214  ;;  %2218 = vtanh.f32 %v1044_v26 }
 0x1db   : > { %1241 = vadd.xlane.f32.xlu2 %v1240_v54  ;;  %v1295_v62 = vadd.f32 %v1279_v23, %v1278_v22  ;;  %v1094_v29 = vadd.f32 1.0, %v1078_v28  ;;  %v1066_v31 = vpack.c.bf16 %v2211_v2, %v2209_v42  ;;  %v1201_v38 = vmul.f32 %v1185_v24, %v1169_v50 }
 0x1dc   : > { %v1202_v17 = vmul.f32 %v1186_v30, %v1170_v60  ;;  %v3297_v33 = vunpack.c.l.bf16 %v2899_v37  ;;  %v3298_v58 = vunpack.c.h.bf16 %v2899_v37  ;;  %v1119_v13 = vunpack.c.l.bf16 %v2937_v41 }
 0x1dd   : > { %1296 = vadd.xlane.f32.xlu1 %v1295_v62  ;;  %v1105_v11 = vpack.c.bf16 %v1094_v29, %v1093_v34  ;;  %v1079_v39 = vunpack.c.l.bf16 %v1066_v31  ;;  %v1080_v6 = vunpack.c.h.bf16 %v1066_v31  ;;  %v1120_v50 = vunpack.c.h.bf16 %v2937_v41 }
 0x1de   : > { %v1147_v56 = vmul.f32 %v1131_v47, %v3297_v33  ;;  %v1148_v19 = vmul.f32 %v1132_v53, %v3298_v58  ;;  %v2217_v9 = vpop.eup %2216  ;;  %v1215_v42 = vpack.c.bf16 %v1202_v17, %v1201_v38  ;;  %v1067_v49 = vpack.c.bf16 %v2215_v44, %v2213_v21 }
 0x1df   : > { %v1133_v40 = vunpack.c.l.bf16 %v1105_v11  ;;  %v1134_v60 = vunpack.c.h.bf16 %v1105_v11  ;;  %v1095_v59 = vadd.f32 1.0, %v1079_v39  ;;  %v1096_v14 = vadd.f32 1.0, %v1080_v6 }
 0x1e0   : > { %v1160_v4 = vpack.c.bf16 %v1148_v19, %v1147_v56  ;;  %v3050_v45 = vunpack.c.l.bf16 %v1215_v42  ;;  %v3052_v37 = vunpack.c.h.bf16 %v1215_v42  ;;  %v2219_v10 = vpop.eup %2218  ;;  %v1081_v25 = vunpack.c.l.bf16 %v1067_v49 }
 0x1e1   : > { %v1149_v20 = vmul.f32 %v1133_v40, %v1117_v12  ;;  %v1150_v63 = vmul.f32 %v1134_v60, %v1118_v32  ;;  %v1106_v7 = vpack.c.bf16 %v1096_v14, %v1095_v59  ;;  %v3299_v26 = vunpack.c.l.bf16 %v2854_v18 }
 0x1e2   : > { %v1187_v57 = vunpack.c.l.bf16 %v1160_v4  ;;  %v1188_v43 = vunpack.c.h.bf16 %v1160_v4  ;;  %v1243_v3 = vadd.f32 %v3052_v37, %v3050_v45  ;;  %v1280_v41 = vmul.f32 %v3050_v45, %v3050_v45 }
 0x1e3   : > { %v1281_v46 = vmul.f32 %v3052_v37, %v3052_v37  ;;  %v3300_v36 = vunpack.c.h.bf16 %v2854_v18  ;;  %v1161_v28 = vpack.c.bf16 %v1150_v63, %v1149_v20  ;;  %v1135_v2 = vunpack.c.l.bf16 %v1106_v7 }
 0x1e4   : > { %v1203_v1 = vmul.f32 %v1187_v57, %v3299_v26  ;;  %v1136_v5 = vunpack.c.h.bf16 %v1106_v7  ;;  %1244 = vadd.xlane.f32.xlu2 %v1243_v3  ;;  %v1082_v12 = vunpack.c.h.bf16 %v1067_v49  ;;  %v1097_v21 = vadd.f32 1.0, %v1081_v25 }
 0x1e5   : > { %v1204_v35 = vmul.f32 %v1188_v43, %v3300_v36  ;;  %v1298_v34 = vadd.f32 %v1281_v46, %v1280_v41  ;;  %v1121_v54 = vunpack.c.l.bf16 %v2954_v8  ;;  %v1189_v23 = vunpack.c.l.bf16 %v1161_v28 }
 0x1e6   : > { %v1190_v32 = vunpack.c.h.bf16 %v1161_v28  ;;  %v1151_v24 = vmul.f32 %v1135_v2, %v1119_v13  ;;  %v1152_v30 = vmul.f32 %v1136_v5, %v1120_v50  ;;  %v1098_v47 = vadd.f32 1.0, %v1082_v12 }
 0x1e7   : > { %v1216_v22 = vpack.c.bf16 %v1204_v35, %v1203_v1  ;;  %1299 = vadd.xlane.f32.xlu1 %v1298_v34  ;;  %v1122_v53 = vunpack.c.h.bf16 %v2954_v8  ;;  %v1068_v18 = vpack.c.bf16 %v2219_v10, %v2217_v9  ;;  %v3301_v29 = vunpack.c.l.bf16 %v2811_v51 }
 0x1e8   : > { %v3302_v38 = vunpack.c.h.bf16 %v2811_v51  ;;  %v1162_v33 = vpack.c.bf16 %v1152_v30, %v1151_v24  ;;  %v1107_v56 = vpack.c.bf16 %v1098_v47, %v1097_v21  ;;  %v3303_v60 = vunpack.c.l.bf16 %v2813_v52 }
 0x1e9   : > { %v3066_v44 = vunpack.c.l.bf16 %v1216_v22  ;;  %v3068_v62 = vunpack.c.h.bf16 %v1216_v22  ;;  %v1205_v31 = vmul.f32 %v1189_v23, %v3301_v29  ;;  %v1083_v58 = vunpack.c.l.bf16 %v1068_v18 }
 0x1ea   : > { %v1206_v17 = vmul.f32 %v1190_v32, %v3302_v38  ;;  %v1084_v19 = vunpack.c.h.bf16 %v1068_v18  ;;  %v1191_v13 = vunpack.c.l.bf16 %v1162_v33  ;;  %v1192_v9 = vunpack.c.h.bf16 %v1162_v33 }
 0x1eb   : > { %v1246_v11 = vadd.f32 %v3068_v62, %v3066_v44  ;;  %v1282_v8 = vmul.f32 %v3066_v44, %v3066_v44  ;;  %v1283_v39 = vmul.f32 %v3068_v62, %v3068_v62  ;;  %v1137_v42 = vunpack.c.l.bf16 %v1107_v56 }
 0x1ec   : > { %v1217_v6 = vpack.c.bf16 %v1206_v17, %v1205_v31  ;;  %v1138_v4 = vunpack.c.h.bf16 %v1107_v56  ;;  %v1099_v40 = vadd.f32 1.0, %v1083_v58  ;;  %v1207_v59 = vmul.f32 %v1191_v13, %v3303_v60 }
 0x1ed   : > { %1247 = vadd.xlane.f32.xlu0 %v1246_v11  ;;  %v1301_v51 = vadd.f32 %v1283_v39, %v1282_v8  ;;  %v3304_v14 = vunpack.c.h.bf16 %v2813_v52  ;;  %v1153_v43 = vmul.f32 %v1137_v42, %v1121_v54  ;;  %v1100_v7 = vadd.f32 1.0, %v1084_v19 }
 0x1ee   : > { %v3080_v50 = vunpack.c.l.bf16 %v1217_v6  ;;  %v3082_v49 = vunpack.c.h.bf16 %v1217_v6  ;;  %v1154_v10 = vmul.f32 %v1138_v4, %v1122_v53  ;;  %v1177_v25 = vunpack.c.l.bf16 %v2815_v61 }
 0x1ef   : > { %v1208_v57 = vmul.f32 %v1192_v9, %v3304_v14  ;;  %1302 = vadd.xlane.f32.xlu2 %v1301_v51  ;;  %v1178_v46 = vunpack.c.h.bf16 %v2815_v61  ;;  %v1108_v26 = vpack.c.bf16 %v1100_v7, %v1099_v40  ;;  %v1123_v1 = vunpack.c.l.bf16 %v2971_v16 }
 0x1f0   : > { %v1284_v20 = vmul.f32 %v3080_v50, %v3080_v50  ;;  %v1285_v63 = vmul.f32 %v3082_v49, %v3082_v49  ;;  %v1163_v41 = vpack.c.bf16 %v1154_v10, %v1153_v43  ;;  %v1249_v52 = vadd.f32 %v3082_v49, %v3080_v50  ;;  %v2040_v43 = vld [vmem:[#allocation8 + $0x38] sm:$0xff] }
 0x1f1   : > { %v1218_v3 = vpack.c.bf16 %v1208_v57, %v1207_v59  ;;  %v1124_v34 = vunpack.c.h.bf16 %v2971_v16  ;;  %v1139_v12 = vunpack.c.l.bf16 %v1108_v26  ;;  %v1140_v21 = vunpack.c.h.bf16 %v1108_v26  ;;  %v2048_v10 = vld [vmem:[#allocation8 + $0x78] sm:$0xff]  ;;  %1604 = vmatpush.bf16.msrb.mxu0 %v2040_v43 }
 0x1f2   : > { %v1193_v28 = vunpack.c.l.bf16 %v1163_v41  ;;  %v1194_v2 = vunpack.c.h.bf16 %v1163_v41  ;;  %v1304_v5 = vadd.f32 %v1285_v63, %v1284_v20  ;;  %v1179_v53 = vunpack.c.l.bf16 %v2817_v0  ;;  %1633 = vmatpush.bf16.msrb.mxu1 %v2048_v10  ;;  %v2039_v41 = vld [vmem:[#allocation8 + $0x30] sm:$0xff] }
 0x1f3   : > { %v3097_v36 = vunpack.c.l.bf16 %v1218_v3  ;;  %v3099_v35 = vunpack.c.h.bf16 %v1218_v3  ;;  %v1155_v24 = vmul.f32 %v1139_v12, %v1123_v1  ;;  %v1156_v30 = vmul.f32 %v1140_v21, %v1124_v34  ;;  %v2038_v1 = vld [vmem:[#allocation8 + $0x28] sm:$0xff]  ;;  %v2037_v21 = vld [vmem:[#allocation8 + $0x20] sm:$0xff] }
 0x1f4   : > { %v1209_v23 = vmul.f32 %v1193_v28, %v1177_v25  ;;  %v1210_v32 = vmul.f32 %v1194_v2, %v1178_v46  ;;  %v1180_v33 = vunpack.c.h.bf16 %v2817_v0  ;;  %v2442_v40 = vmov 256.0   ;;  %v2047_v46 = vld [vmem:[#allocation8 + $0x70] sm:$0xff]  ;;  %v2046_v28 = vld [vmem:[#allocation8 + $0x68] sm:$0xff] }
 0x1f5   : > { %v1252_v61 = vadd.f32 %v3099_v35, %v3097_v36  ;;  %v1286_v54 = vmul.f32 %v3097_v36, %v3097_v36  ;;  %v1287_v22 = vmul.f32 %v3099_v35, %v3099_v35  ;;  %1250 = vadd.xlane.f32.xlu0 %v1249_v52  ;;  %v1164_v16 = vpack.c.bf16 %v1156_v30, %v1155_v24 }
 0x1f6   : > { %v1219_v47 = vpack.c.bf16 %v1210_v32, %v1209_v23  ;;  %2220 = vrcp.f32 %v2442_v40  ;;  %1605 = vmatpush.bf16.msrb.mxu0 %v2039_v41  ;;  %1634 = vmatpush.bf16.msrb.mxu1 %v2047_v46  ;;  %v2036_v23 = vld [vmem:[#allocation8 + $0x18] sm:$0xff] }
 0x1f7   : > { %1253 = vadd.xlane.f32.xlu1 %v1252_v61  ;;  %1305 = vadd.xlane.f32.xlu2 %v1304_v5  ;;  %v1307_v18 = vadd.f32 %v1287_v22, %v1286_v54  ;;  %v1195_v38 = vunpack.c.l.bf16 %v1164_v16  ;;  %v1196_v17 = vunpack.c.h.bf16 %v1164_v16  ;;  %v2045_v61 = vld [vmem:[#allocation8 + $0x60] sm:$0xff]  ;;  %v2044_v32 = vld [vmem:[#allocation8 + $0x58] sm:$0xff] }
 0x1f8   : > { %v3109_v29 = vunpack.c.l.bf16 %v1219_v47  ;;  %v3111_v31 = vunpack.c.h.bf16 %v1219_v47 }
 0x1f9   : > { %v1211_v58 = vmul.f32 %v1195_v38, %v1179_v53  ;;  %v1212_v19 = vmul.f32 %v1196_v17, %v1180_v33  ;;  %v2043_v38 = vld [vmem:[#allocation8 + $0x50] sm:$0xff] }
 0x1fa   : > { %v1255_v56 = vadd.f32 %v3111_v31, %v3109_v29  ;;  %v1288_v11 = vmul.f32 %v3109_v29, %v3109_v29  ;;  %v1289_v8 = vmul.f32 %v3111_v31, %v3111_v31  ;;  %1606 = vmatpush.bf16.msrb.mxu0 %v2038_v1  ;;  %1635 = vmatpush.bf16.msrb.mxu1 %v2046_v28 }
 0x1fb   : > { %v1220_v39 = vpack.c.bf16 %v1212_v19, %v1211_v58 }
 0x1fc   : > { %v1310_v9 = vadd.f32 %v1289_v8, %v1288_v11  ;;  %v2221_v60 = vpop.eup %2220  ;;  %v2034_v11 = vld [vmem:[#allocation8 + $0x8] sm:$0xff] }
 0x1fd   : > { %1308 = vadd.xlane.f32.xlu0 %v1307_v18  ;;  %v3120_v6 = vunpack.c.l.bf16 %v1220_v39  ;;  %v3122_v13 = vunpack.c.h.bf16 %v1220_v39  ;;  %v1262_v59 = vmul.f32 256.0, %v2221_v60  ;;  %vm1266_vm9 = vweird.f32 %v2221_v60  ;;  %v2035_v18 = vld [vmem:[#allocation8 + $0x10] sm:$0xff]  ;;  %v2042_v8 = vld [vmem:[#allocation8 + $0x48] sm:$0xff] }
 0x1fe   : > { %1607 = vmatpush.bf16.msrb.mxu0 %v2037_v21  ;;  %1636 = vmatpush.bf16.msrb.mxu1 %v2045_v61 }
 0x1ff   : > { %1256 = vadd.xlane.f32.xlu1 %v1255_v56  ;;  %v1258_v0 = vadd.f32 %v3122_v13, %v3120_v6  ;;  %v1290_v42 = vmul.f32 %v3120_v6, %v3120_v6  ;;  %v1291_v4 = vmul.f32 %v3122_v13, %v3122_v13  ;;  %v1263_v14 = vsub.f32 1.0, %v1262_v59 }
 0x201   : > { %1259 = vadd.xlane.f32.xlu2 %v1258_v0  ;;  %v1313_v51 = vadd.f32 %v1291_v4, %v1290_v42  ;;  %v1264_v57 = vmul.f32 %v2221_v60, %v1263_v14  ;;  %v2033_v4 = vld [vmem:[#allocation8] sm:$0xff] }
 0x202   : > { %1608 = vmatpush.bf16.msrb.mxu0 %v2036_v23  ;;  %1637 = vmatpush.bf16.msrb.mxu1 %v2044_v32 }
 0x203   : > { %v1265_v20 = vadd.f32 %v2221_v60, %v1264_v57 }
 0x205   : > { %1311 = vadd.xlane.f32.xlu0 %v1310_v9  ;;  %v3130_v63 = vsel %vm1266_vm9, %v2221_v60, %v1265_v20 }
 0x206   : > { %1609 = vmatpush.bf16.msrb.mxu0 %v2035_v18  ;;  %1638 = vmatpush.bf16.msrb.mxu1 %v2043_v38 }
 0x207   : > { %1314 = vadd.xlane.f32.xlu1 %v1313_v51  ;;  %v2041_v51 = vld [vmem:[#allocation8 + $0x40] sm:$0xff] }
 0x20a   : > { %1610 = vmatpush.bf16.msrb.mxu0 %v2034_v11  ;;  %1639 = vmatpush.bf16.msrb.mxu1 %v2042_v8 }
 0x20e   : > { %1611 = vmatpush.bf16.msrb.mxu0 %v2033_v4  ;;  %1640 = vmatpush.bf16.msrb.mxu1 %v2041_v51 }
 0x244   : > { %v1239_v7 = vpop.xlane.xlu1 %1238 }
 0x245   : > { %v3133_v25 = vmul.f32 %v3130_v63, %v1239_v7 }
 0x246   : > { %v1294_v3 = vpop.xlane.xlu0 %1293 }
 0x247   : > { %v1316_v52 = vmul.f32 %v1294_v3, %v3130_v63  ;;  %v1324_v26 = vmul.f32 %v3133_v25, %v3133_v25 }
 0x249   : > { %v1332_v2 = vsub.f32 %v1316_v52, %v1324_v26 }
 0x24b   : > { %v1340_v5 = vmax.f32 %v1332_v2, 0.0 }
 0x24d   : > { %v1364_v34 = vadd.f32 1e-07, %v1340_v5 }
 0x24e   : > { %v1242_v12 = vpop.xlane.xlu2 %1241 }
 0x24f   : > { %2222 = vrsqrt.f32 %v1364_v34  ;;  %v3139_v54 = vmul.f32 %v3130_v63, %v1242_v12  ;;  %vm1378_vm11 = vweird.f32 %v1364_v34  ;;  %v1348_v12 = vsub.f32 %v3007_v55, %v3133_v25 }
 0x250   : > { %v1297_v22 = vpop.xlane.xlu1 %1296 }
 0x251   : > { %v1325_v24 = vmul.f32 %v3139_v54, %v3139_v54  ;;  %v1317_v30 = vmul.f32 %v1297_v22, %v3130_v63  ;;  %v1349_v22 = vsub.f32 %v3009_v27, %v3133_v25  ;;  %v1350_v18 = vsub.f32 %v3028_v48, %v3139_v54 }
 0x252   : > { %v1351_v27 = vsub.f32 %v3030_v15, %v3139_v54 }
 0x253   : > { %v1333_v47 = vsub.f32 %v1317_v30, %v1325_v24 }
 0x255   : > { %v2223_v16 = vpop.eup %2222  ;;  %v1341_v53 = vmax.f32 %v1333_v47, 0.0 }
 0x256   : > { %v1373_v17 = vmul.f32 %v2223_v16, %v1364_v34  ;;  %vm1379_vm10 = vweird.f32 %v2223_v16 }
 0x257   : > { %v1365_v33 = vadd.f32 1e-07, %v1341_v53  ;;  %v1245_v56 = vpop.xlane.xlu2 %1244  ;;  %vm1380_vm12 = vmor %vm1378_vm11, %vm1379_vm10 }
 0x258   : > { %v1374_v58 = vmul.f32 %v2223_v16, %v1373_v17  ;;  %v3145_v19 = vmul.f32 %v3130_v63, %v1245_v56 }
 0x259   : > { %2224 = vrsqrt.f32 %v1365_v33  ;;  %vm1388_vm14 = vweird.f32 %v1365_v33 }
 0x25a   : > { %v1300_v39 = vpop.xlane.xlu1 %1299  ;;  %v1326_v9 = vmul.f32 %v3145_v19, %v3145_v19  ;;  %v1375_v42 = vmul.f32 0.5, %v1374_v58 }
 0x25b   : > { %v1318_v0 = vmul.f32 %v1300_v39, %v3130_v63 }
 0x25c   : > { %v1376_v43 = vsub.f32 1.5, %v1375_v42 }
 0x25d   : > { %v1334_v40 = vsub.f32 %v1318_v0, %v1326_v9 }
 0x25e   : > { %v1377_v1 = vmul.f32 %v2223_v16, %v1376_v43 }
 0x25f   : > { %v2225_v59 = vpop.eup %2224  ;;  %v1342_v14 = vmax.f32 %v1334_v40, 0.0 }
 0x260   : > { %v1248_v60 = vpop.xlane.xlu0 %1247  ;;  %v1383_v10 = vmul.f32 %v2225_v59, %v1365_v33  ;;  %vm1389_vm13 = vweird.f32 %v2225_v59  ;;  %v1381_v24 = vsel %vm1380_vm12, %v2223_v16, %v1377_v1 }
 0x261   : > { %v3151_v57 = vmul.f32 %v3130_v63, %v1248_v60  ;;  %v3153_v7 = vadd.f32 1e-07, %v1342_v14  ;;  %vm1390_vm15 = vmor %vm1388_vm14, %vm1389_vm13  ;;  %v1452_v17 = vmul.f32 %v1381_v24, %v1348_v12  ;;  %v1453_v58 = vmul.f32 %v1381_v24, %v1349_v22 }
 0x262   : > { %v1303_v20 = vpop.xlane.xlu2 %1302  ;;  %v1384_v41 = vmul.f32 %v2225_v59, %v1383_v10 }
 0x263   : > { %v1319_v3 = vmul.f32 %v1303_v20, %v3130_v63  ;;  %v1327_v46 = vmul.f32 %v3151_v57, %v3151_v57  ;;  %2226 = vrsqrt.f32 %v3153_v7  ;;  %vm1398_vm1 = vweird.f32 %v3153_v7 }
 0x264   : > { %v1385_v52 = vmul.f32 0.5, %v1384_v41 }
 0x265   : > { %v1335_v26 = vsub.f32 %v1319_v3, %v1327_v46 }
 0x266   : > { %v1386_v28 = vsub.f32 1.5, %v1385_v52 }
 0x267   : > { %v1343_v2 = vmax.f32 %v1335_v26, 0.0 }
 0x268   : > { %v1251_v5 = vpop.xlane.xlu0 %1250  ;;  %v1387_v34 = vmul.f32 %v2225_v59, %v1386_v28 }
 0x269   : > { %v3162_v21 = vmul.f32 %v3130_v63, %v1251_v5  ;;  %v3166_v23 = vadd.f32 1e-07, %v1343_v2  ;;  %v2227_v30 = vpop.eup %2226 }
 0x26a   : > { %v1254_v61 = vpop.xlane.xlu1 %1253  ;;  %v1306_v32 = vpop.xlane.xlu2 %1305  ;;  %v1393_v25 = vmul.f32 %v2227_v30, %v3153_v7  ;;  %v1391_v38 = vsel %vm1390_vm15, %v2225_v59, %v1387_v34  ;;  %vm1399_vm0 = vweird.f32 %v2227_v30 }
 0x26b   : > { %v1320_v47 = vmul.f32 %v1306_v32, %v3130_v63  ;;  %v1328_v55 = vmul.f32 %v3162_v21, %v3162_v21  ;;  %v3172_v53 = vmul.f32 %v3130_v63, %v1254_v61  ;;  %2228 = vrsqrt.f32 %v3166_v23  ;;  %vm1400_vm2 = vmor %vm1398_vm1, %vm1399_vm0 }
 0x26c   : > { %v1394_v33 = vmul.f32 %v2227_v30, %v1393_v25  ;;  %v1454_v56 = vmul.f32 %v1391_v38, %v1350_v18  ;;  %v1455_v11 = vmul.f32 %v1391_v38, %v1351_v27  ;;  %v1352_v61 = vsub.f32 %v3050_v45, %v3145_v19 }
 0x26d   : > { %v1336_v16 = vsub.f32 %v1320_v47, %v1328_v55  ;;  %v1329_v48 = vmul.f32 %v3172_v53, %v3172_v53  ;;  %vm1408_vm4 = vweird.f32 %v3166_v23  ;;  %v1353_v55 = vsub.f32 %v3052_v37, %v3145_v19 }
 0x26e   : > { %v1395_v39 = vmul.f32 0.5, %v1394_v33  ;;  %v1468_v9 = vpack.c.bf16 %v1454_v56, %v1452_v17  ;;  %v1469_v15 = vpack.c.bf16 %v1455_v11, %v1453_v58  ;;  %v1354_v18 = vsub.f32 %v3066_v44, %v3151_v57 }
 0x26f   : > { %v1344_v8 = vmax.f32 %v1336_v16, 0.0  ;;  %v1355_v45 = vsub.f32 %v3068_v62, %v3151_v57 }
 0x270   : > { %v1309_v54 = vpop.xlane.xlu0 %1308  ;;  %1612 = vmatmul.bf16.vlgmr.msrb.gmra.mxu0 %v1468_v9  ;;  %1641 = vmatmul.bf16.vlgmr.msrb.gmra.mxu1 %v1469_v15  ;;  %v1396_v40 = vsub.f32 1.5, %v1395_v39 }
 0x271   : > { %v3183_v0 = vadd.f32 1e-07, %v1344_v8  ;;  %v1321_v42 = vmul.f32 %v1309_v54, %v3130_v63  ;;  %v2229_v51 = vpop.eup %2228 }
 0x272   : > { %v1257_v4 = vpop.xlane.xlu1 %1256  ;;  %v1403_v60 = vmul.f32 %v2229_v51, %v3166_v23  ;;  %v1397_v20 = vmul.f32 %v2227_v30, %v1396_v40  ;;  %vm1409_vm3 = vweird.f32 %v2229_v51  ;;  %v1358_v40 = vsub.f32 %v3097_v36, %v3172_v53 }
 0x273   : > { %2230 = vrsqrt.f32 %v3183_v0  ;;  %v1337_v59 = vsub.f32 %v1321_v42, %v1329_v48  ;;  %v3189_v14 = vmul.f32 %v3130_v63, %v1257_v4  ;;  %vm1410_vm5 = vmor %vm1408_vm4, %vm1409_vm3  ;;  %vm1418_vm8 = vweird.f32 %v3183_v0 }
 0x274   : > { %v1404_v43 = vmul.f32 %v2229_v51, %v1403_v60  ;;  %v1260_v52 = vpop.xlane.xlu2 %1259  ;;  %v1401_v32 = vsel %vm1400_vm2, %v2227_v30, %v1397_v20  ;;  %v1359_v60 = vsub.f32 %v3099_v35, %v3172_v53 }
 0x275   : > { %v1345_v10 = vmax.f32 %v1337_v59, 0.0  ;;  %v1330_v46 = vmul.f32 %v3189_v14, %v3189_v14  ;;  %v3196_v1 = vmul.f32 %v3130_v63, %v1260_v52  ;;  %v1456_v16 = vmul.f32 %v1401_v32, %v1352_v61 }
 0x276   : > { %v1405_v3 = vmul.f32 0.5, %v1404_v43  ;;  %v1457_v23 = vmul.f32 %v1401_v32, %v1353_v55  ;;  %v1360_v32 = vsub.f32 %v3109_v29, %v3189_v14 }
 0x277   : > { %v3191_v41 = vadd.f32 1e-07, %v1345_v10  ;;  %v1331_v24 = vmul.f32 %v3196_v1, %v3196_v1 }
 0x278   : > { %v1312_v26 = vpop.xlane.xlu0 %1311  ;;  %v1406_v5 = vsub.f32 1.5, %v1405_v3 }
 0x279   : > { %v2231_v28 = vpop.eup %2230  ;;  %2232 = vrsqrt.f32 %v3191_v41  ;;  %v1322_v2 = vmul.f32 %v1312_v26, %v3130_v63  ;;  %vm1428_vm10 = vweird.f32 %v3191_v41 }
 0x27a   : > { %v1315_v12 = vpop.xlane.xlu1 %1314  ;;  %v1413_v22 = vmul.f32 %v2231_v28, %v3183_v0  ;;  %v1407_v7 = vmul.f32 %v2229_v51, %v1406_v5  ;;  %vm1419_vm6 = vweird.f32 %v2231_v28  ;;  %v1357_v0 = vsub.f32 %v3082_v49, %v3162_v21 }
 0x27b   : > { %v1338_v34 = vsub.f32 %v1322_v2, %v1330_v46  ;;  %v1323_v47 = vmul.f32 %v1315_v12, %v3130_v63  ;;  %vm1420_vm9 = vmor %vm1418_vm8, %vm1419_vm6 }
 0x27c   : > { %v1414_v27 = vmul.f32 %v2231_v28, %v1413_v22  ;;  %v1411_v25 = vsel %vm1410_vm5, %v2229_v51, %v1407_v7  ;;  %v1356_v51 = vsub.f32 %v3080_v50, %v3162_v21  ;;  %v1362_v21 = vsub.f32 %v3120_v6, %v3196_v1 }
 0x27d   : > { %v1346_v30 = vmax.f32 %v1338_v34, 0.0  ;;  %v1339_v38 = vsub.f32 %v1323_v47, %v1331_v24  ;;  %v1458_v33 = vmul.f32 %v1411_v25, %v1354_v18  ;;  %v1459_v56 = vmul.f32 %v1411_v25, %v1355_v45 }
 0x27e   : > { %v1415_v17 = vmul.f32 0.5, %v1414_v27  ;;  %v1361_v24 = vsub.f32 %v3111_v31, %v3189_v14 }
 0x27f   : > { %v2233_v63 = vpop.eup %2232  ;;  %v1370_v58 = vadd.f32 1e-07, %v1346_v30  ;;  %v1347_v11 = vmax.f32 %v1339_v38, 0.0  ;;  %v1470_v19 = vpack.c.bf16 %v1458_v33, %v1456_v16  ;;  %v1471_v44 = vpack.c.bf16 %v1459_v56, %v1457_v23 }
 0x280   : > { %v1423_v37 = vmul.f32 %v2233_v63, %v3191_v41  ;;  %v1416_v62 = vsub.f32 1.5, %v1415_v17  ;;  %vm1429_vm7 = vweird.f32 %v2233_v63 }
 0x281   : > { %2234 = vrsqrt.f32 %v1370_v58  ;;  %v1371_v8 = vadd.f32 1e-07, %v1347_v11  ;;  %1617 = vmatmul.bf16.gmra.mxu0 %v1470_v19  ;;  %1646 = vmatmul.bf16.gmra.mxu1 %v1471_v44  ;;  %vm1430_vm11 = vmor %vm1428_vm10, %vm1429_vm7  ;;  %vm1438_vm0 = vweird.f32 %v1370_v58 }
 0x282   : > { %v1424_v57 = vmul.f32 %v2233_v63, %v1423_v37  ;;  %v1417_v39 = vmul.f32 %v2231_v28, %v1416_v62 }
 0x283   : > { %2236 = vrsqrt.f32 %v1371_v8  ;;  %vm1448_vm14 = vweird.f32 %v1371_v8 }
 0x284   : > { %v1425_v48 = vmul.f32 0.5, %v1424_v57  ;;  %v1421_v59 = vsel %vm1420_vm9, %v2231_v28, %v1417_v39  ;;  %v1363_v28 = vsub.f32 %v3122_v13, %v3196_v1 }
 0x285   : > { %v1460_v52 = vmul.f32 %v1421_v59, %v1356_v51  ;;  %v1461_v26 = vmul.f32 %v1421_v59, %v1357_v0 }
 0x286   : > { %v1426_v9 = vsub.f32 1.5, %v1425_v48 }
 0x287   : > { %v2235_v15 = vpop.eup %2234 }
 0x288   : > { %v1433_v54 = vmul.f32 %v2235_v15, %v1370_v58  ;;  %v1427_v42 = vmul.f32 %v2233_v63, %v1426_v9  ;;  %vm1439_vm13 = vweird.f32 %v2235_v15 }
 0x289   : > { %v2237_v4 = vpop.eup %2236  ;;  %vm1440_vm1 = vmor %vm1438_vm0, %vm1439_vm13 }
 0x28a   : > { %v1434_v43 = vmul.f32 %v2235_v15, %v1433_v54  ;;  %v1443_v10 = vmul.f32 %v2237_v4, %v1371_v8  ;;  %v1431_v20 = vsel %vm1430_vm11, %v2233_v63, %v1427_v42  ;;  %vm1449_vm12 = vweird.f32 %v2237_v4 }
 0x28b   : > { %v1462_v3 = vmul.f32 %v1431_v20, %v1358_v40  ;;  %v1463_v41 = vmul.f32 %v1431_v20, %v1359_v60  ;;  %vm1450_vm15 = vmor %vm1448_vm14, %vm1449_vm12 }
 0x28c   : > { %v1444_v46 = vmul.f32 %v2237_v4, %v1443_v10  ;;  %v1435_v50 = vmul.f32 0.5, %v1434_v43 }
 0x28d   : > { %v1472_v5 = vpack.c.bf16 %v1462_v3, %v1460_v52  ;;  %v1473_v36 = vpack.c.bf16 %v1463_v41, %v1461_v26 }
 0x28e   : > { %v1445_v2 = vmul.f32 0.5, %v1444_v46  ;;  %v1436_v61 = vsub.f32 1.5, %v1435_v50 }
 0x290   : > { %v1446_v12 = vsub.f32 1.5, %v1445_v2  ;;  %v1437_v53 = vmul.f32 %v2235_v15, %v1436_v61 }
 0x291   : > { %1622 = vmatmul.bf16.gmra.mxu0 %v1472_v5  ;;  %1651 = vmatmul.bf16.gmra.mxu1 %v1473_v36 }
 0x292   : > { %v1447_v35 = vmul.f32 %v2237_v4, %v1446_v12  ;;  %v1441_v22 = vsel %vm1440_vm1, %v2235_v15, %v1437_v53 }
 0x293   : > { %v1464_v47 = vmul.f32 %v1441_v22, %v1360_v32  ;;  %v1465_v55 = vmul.f32 %v1441_v22, %v1361_v24 }
 0x294   : > { %v1451_v49 = vsel %vm1450_vm15, %v2237_v4, %v1447_v35 }
 0x295   : > { %v1466_v34 = vmul.f32 %v1451_v49, %v1362_v21  ;;  %v1467_v7 = vmul.f32 %v1451_v49, %v1363_v28 }
 0x297   : > { %v1474_v18 = vpack.c.bf16 %v1466_v34, %v1464_v47  ;;  %v1475_v45 = vpack.c.bf16 %v1467_v7, %v1465_v55 }
 0x2a1   : > { %1627 = vmatmul.bf16.gmra.mxu0 %v1474_v18  ;;  %1656 = vmatmul.bf16.gmra.mxu1 %v1475_v45 }
 0x2ed   : > { %v1613_v6 = vpop.f32.mrf.mxu0  ;;  %v1642_v27 = vpop.f32.mrf.mxu1 }
 0x2ee   : > { %v1643_v13 = vadd.f32 %v1642_v27, %v1613_v6 }
 0x2f0   : > { %1662 = vst [vmem:[%s3234_s26] sm:$0xff] %v1643_v13 }
 0x2f5   : > { %v1615_v29 = vpop.f32.mrf.mxu0  ;;  %v1644_v31 = vpop.f32.mrf.mxu1 }
 0x2f6   : > { %v1645_v14 = vadd.f32 %v1644_v31, %v1615_v29 }
 0x2f8   : > { %1663 = vst [vmem:[%s3234_s26 + $0x8] sm:$0xff] %v1645_v14 }
 0x2fe   : > { %v1618_v1 = vpop.f32.mrf.mxu0  ;;  %v1647_v30 = vpop.f32.mrf.mxu1 }
 0x2ff   : > { %v1648_v25 = vadd.f32 %v1647_v30, %v1618_v1 }
 0x301   : > { %1664 = vst [vmem:[%s3234_s26 + $0x10] sm:$0xff] %v1648_v25 }
 0x306   : > { %v1620_v16 = vpop.f32.mrf.mxu0  ;;  %v1649_v38 = vpop.f32.mrf.mxu1 }
 0x307   : > { %v1650_v17 = vadd.f32 %v1649_v38, %v1620_v16 }
 0x309   : > { %1665 = vst [vmem:[%s3234_s26 + $0x18] sm:$0xff] %v1650_v17 }
 0x30e   : > { %v1623_v33 = vpop.f32.mrf.mxu0  ;;  %v1652_v23 = vpop.f32.mrf.mxu1 }
 0x30f   : > { %v1653_v56 = vadd.f32 %v1652_v23, %v1623_v33 }
 0x311   : > { %1666 = vst [vmem:[%s3234_s26 + $0x20] sm:$0xff] %v1653_v56 }
 0x316   : > { %v1625_v63 = vpop.f32.mrf.mxu0  ;;  %v1654_v58 = vpop.f32.mrf.mxu1 }
 0x317   : > { %v1655_v11 = vadd.f32 %v1654_v58, %v1625_v63 }
 0x319   : > { %1667 = vst [vmem:[%s3234_s26 + $0x28] sm:$0xff] %v1655_v11 }
 0x31e   : > { %v1628_v37 = vpop.f32.mrf.mxu0  ;;  %v1657_v19 = vpop.f32.mrf.mxu1 }
 0x31f   : > { %v1658_v44 = vadd.f32 %v1657_v19, %v1628_v37 }
 0x321   : > { %1668 = vst [vmem:[%s3234_s26 + $0x30] sm:$0xff] %v1658_v44 }
 0x326   : > { %v1630_v8 = vpop.f32.mrf.mxu0  ;;  %v1659_v62 = vpop.f32.mrf.mxu1 }
 0x327   : > { %v1660_v57 = vadd.f32 %v1659_v62, %v1630_v8 }
 0x329   : > { %1669 = vst [vmem:[%s3234_s26 + $0x38] sm:$0xff] %v1660_v57 }
 0x32a   : > { %2385 = shalt.err (!%p2382_p10)
}
 0x32b   : > { %s2443_s29 = smov 128   ;;  %s2444_s28 = smov 8  }
 0x32c   : > { %2099 = dma.vmem_to_hbm [thread:$0]  (%p2555_p3), %s1684_s14, 1024, %s1686_s20, %s1671_s6, %s2443_s29, %s2443_s29, %s2444_s28  }
 0x32d PF: > { %s1700_s21 = sand.u32 1, %s2420_s15   ;;  %p3305_p12 = scmp.ge.s32.totalorder %s2432_s18, 2 }
 0x32e   : > { %s1701_s26 = scalar_lea.sflag [#allocation4], %s1700_s21 }
 0x32f   : > { %p2116_p13 = pnand %p3305_p12, %p2505_p6 }
 0x331   : > { %p2117_p0 = pneg %p2116_p13 }
 0x333   : > { %2415 = dma.done.wait (%p2117_p0), %s1701_s26, 1024  }
 0x334   : > { %2417 = vsyncadd (%p2117_p0), %s1701_s26, 4294966272  ;;  %p19_p5 = scmp.ge.s32.totalorder %s2542_s25, 4   ;;  %s3306_s15 = smov %s2424_s16 }
 0x335   : > { %s3307_s16 = smov %s2428_s17  ;;  %s3308_s17 = smov %s2551_s30 }
 0x336   : > { %s3309_s18 = smov %s2542_s25  ;;  %21 = sbr.rel (!%p19_p5) target bundleno = 7 (0x7), region = 93 }
 0x33b   :  { %1707 = vsyncpa [#allocation3], 1 }
 0x33c   :  { %1709 = vsyncpa [#allocation3 + $0x1], 1 }
 0x33d   :  { %1710 = vsyncpa [#allocation6], 1 }
 0x33e   :  { %1711 = vsyncpa [#allocation9], 1 }
 0x33f   :  { %1712 = vsyncpa [#allocation4], 1 }
 0x340   :  { %1714 = vsyncpa [#allocation4 + $0x1], 1 }

</bundles_post_ra>
